<compile_context>
chip_gen: v7x
topology: tpu7x:2x2x1
jax: 0.10.0
libtpu: 0.0.40
codegen_flags: <defaults>
</compile_context>

<pallas_src>
import jax
import jax.numpy as jnp
from jax import lax
from jax.experimental import pallas as pl
from jax.experimental.pallas import tpu as pltpu


def _round_up(x, m):
    return (x + m - 1) // m * m


def _pick_t_tile(T, N, out_frame_bytes, max_block_bytes=4 << 20, min_steps=4):
    """Largest divisor of T whose output block stays under max_block_bytes while
    keeping enough grid steps for megacore / 2-TC splitting."""
    divs = [t for t in range(1, T + 1) if T % t == 0]
    fitting = [t for t in divs if t * out_frame_bytes <= max_block_bytes] or [1]
    for t in sorted(fitting, reverse=True):
        if N * (T // t) >= min_steps:
            return t
    return max(fitting)


def conv3d_configurable_forward(x_ncdhw, w1, w2, b2, dilation_rate,
                                t_tile=None, compute_dtype=jnp.float32):
    """x_ncdhw: (N, Cin, T, H, W) f32
    w1: (3, 3, Cin, 2F)  conv1 weight (kh, kw, cin, cout), no bias
    w2: (3, 2F, F)       conv2 weight (kt, cin, cout)
    b2: (F,)             conv2 bias
    Returns (N, F, T, H, W) f32 (PyTorch NCDHW)."""
    N, Cin, T, H, W = x_ncdhw.shape
    F = w2.shape[-1]
    d = int(dilation_rate)
    HW = H * W
    Tp = T + 2 * d
    K = 27 * Cin                      # (kh, kw, kt, cin) folded contraction
    x_item = jnp.dtype(compute_dtype).itemsize

    # ---- fold conv2 o conv1 (valid: conv1 has no bias, no nonlinearity between) --
    # w_full[f, (kh,kw,kt,cin)] = sum_c2 w2[kt, c2, f] * w1[kh, kw, cin, c2]
    w_comb = jnp.einsum('kcf,abic->abkif', w2.astype(jnp.float32),
                        w1.astype(jnp.float32))                 # (3,3,3,Cin,F)
    w_full = jnp.transpose(w_comb.reshape(K, F), (1, 0)).astype(compute_dtype)
    b_col = b2.reshape(F, 1).astype(jnp.float32)

    # ---- border masks for the 9 spatial taps (depend only on the lane position) --
    hh = jnp.arange(H).reshape(H, 1)
    ww = jnp.arange(W).reshape(1, W)
    masks = []
    for kh in range(3):
        for kw in range(3):
            dh, dw = kh - 1, kw - 1
            m = ((hh + dh >= 0) & (hh + dh < H)
                 & (ww + dw >= 0) & (ww + dw < W))
            masks.append(m.reshape(1, HW))
    mask_arr = jnp.stack(masks, axis=0).astype(compute_dtype)   # (9, 1, HW)

    # ---- input staging: NCDHW -> (N, T+2d, Cin, H*W); one fused pad/transpose/cast
    x = jnp.transpose(x_ncdhw.reshape(N, Cin, T, HW), (0, 2, 1, 3))
    x = jnp.pad(x.astype(compute_dtype), ((0, 0), (d, d), (0, 0), (0, 0)))

    # ---- temporal tiling (VMEM-budget aware, keep grid steps for 2-TC chips) -----
    out_frame_bytes = _round_up(F, 8) * _round_up(HW, 128) * 4
    if t_tile is not None and T % int(t_tile) == 0:
        TT = int(t_tile)
    else:
        TT = _pick_t_tile(T, N, out_frame_bytes)
    if HW % 128 != 0:
        # keep the output block equal to the full (F, T*HW) extent so the
        # BlockSpec (8,128) last-dims rule is satisfied for odd frame sizes.
        TT = T
    nT = T // TT

    # ---- fused kernel ------------------------------------------------------------
    def kernel(x_ref, w_ref, b_ref, m_ref, o_ref):
        # x_ref: (T+2d, Cin, HW)  resident input block (fetched once per n)
        # w_ref: (F, 27*Cin)      folded conv2 o conv1 weight
        # b_ref: (F, 1) f32       conv2 bias
        # m_ref: (9, 1, HW)       spatial border masks
        # o_ref: (F, TT*HW) f32   lane-dense output block
        t0 = pl.program_id(1) * TT
        w_mat = w_ref[...]
        bias = b_ref[...]
        for ti in range(TT):                        # unrolled; TT is small & static
            # three dilated temporal taps stacked along the contraction axis
            slab = jnp.concatenate(
                [x_ref[t0 + ti + k * d] for k in range(3)], axis=0)   # (3Cin, HW)
            # 3x3 spatial taps: lane shift + border mask, stacked into K = 27*Cin
            pieces = []
            for tap in range(9):
                dh, dw = tap // 3 - 1, tap % 3 - 1
                s = dh * W + dw
                p = slab if s == 0 else jnp.roll(slab, -s, axis=1) * m_ref[tap]
                pieces.append(p)
            a_mat = jnp.concatenate(pieces, axis=0)                   # (27Cin, HW)
            acc = jnp.dot(w_mat, a_mat, preferred_element_type=jnp.float32)
            o_ref[:, ti * HW:(ti + 1) * HW] = (acc + bias).astype(o_ref.dtype)

    flops = 2 * N * T * HW * K * F
    bytes_accessed = (N * Tp * Cin * HW * x_item          # staged input, read ~once
                      + F * K * x_item + F * 4 + 9 * HW * x_item
                      + N * F * T * HW * 4)                # f32 output

    in_block = Tp * _round_up(Cin, 8) * _round_up(HW, 128) * x_item
    out_block = _round_up(F, 8) * _round_up(TT * HW, 128) * 4
    misc = (_round_up(F, 8) * _round_up(K, 128) * x_item
            + 9 * 8 * _round_up(HW, 128) * x_item + (1 << 20))
    vmem_limit = int(min(max(2 * (in_block + out_block) + misc, 32 << 20), 64 << 20))

    z = pl.pallas_call(
        kernel,
        out_shape=jax.ShapeDtypeStruct((N, F, T * HW), jnp.float32),
        grid=(N, nT),
        in_specs=[
            # constant block index along the t axis -> DMA'd once per batch element
            pl.BlockSpec((None, Tp, Cin, HW), lambda n, t: (n, 0, 0, 0)),
            pl.BlockSpec((F, K), lambda n, t: (0, 0)),
            pl.BlockSpec((F, 1), lambda n, t: (0, 0)),
            pl.BlockSpec((9, 1, HW), lambda n, t: (0, 0, 0)),
        ],
        out_specs=pl.BlockSpec((None, F, TT * HW), lambda n, t: (n, 0, t)),
        compiler_params=pltpu.CompilerParams(
            dimension_semantics=("parallel", "parallel"),
            vmem_limit_bytes=vmem_limit),
        cost_estimate=pl.CostEstimate(flops=flops, transcendentals=0,
                                      bytes_accessed=bytes_accessed),
    )(x, w_full, b_col, mask_arr)

    # (N, F, T*H*W) is already NCDHW-contiguous: free reshape, no transpose pass.
    return z.reshape(N, F, T, H, W)


# ----------------------------------------------------------------------------
# Pure-JAX reference (lax conv, f32, unfused weights) for verification
# ----------------------------------------------------------------------------
def _reference_forward(x_ncdhw, w1, w2, b2, d):
    w1_t = jnp.transpose(w1, (3, 2, 0, 1))[:, :, None, :, :]   # (2F, Cin, 1, 3, 3)
    y = lax.conv_general_dilated(
        x_ncdhw, w1_t, window_strides=(1, 1, 1),
        padding=((0, 0), (1, 1), (1, 1)),
        dimension_numbers=("NCDHW", "OIDHW", "NCDHW"),
        precision=lax.Precision.HIGHEST)
    w2_t = jnp.transpose(w2, (2, 1, 0))[:, :, :, None, None]   # (F, 2F, 3, 1, 1)
    z = lax.conv_general_dilated(
        y, w2_t, window_strides=(1, 1, 1),
        padding=((d, d), (0, 0), (0, 0)),
        rhs_dilation=(d, 1, 1),
        dimension_numbers=("NCDHW", "OIDHW", "NCDHW"),
        precision=lax.Precision.HIGHEST)
    return z + b2[None, :, None, None, None]


if __name__ == "__main__":
    # small shapes consistent with the module
    N, Cin, T, H, W = 2, 4, 8, 16, 16
    filters = 8
    dilation_rate = 2
    C2 = 2 * filters

    key = jax.random.PRNGKey(0)
    k_x, k_w1, k_w2, k_b = jax.random.split(key, 4)

    x = jax.random.normal(k_x, (N, Cin, T, H, W), jnp.float32)
    w1 = jax.random.normal(k_w1, (3, 3, Cin, C2), jnp.float32) * 0.1   # conv1 (no bias)
    w2 = jax.random.normal(k_w2, (3, C2, filters), jnp.float32) * 0.1  # conv2
    b2 = jax.random.normal(k_b, (filters,), jnp.float32) * 0.1         # conv2 bias

    fwd = jax.jit(conv3d_configurable_forward, static_argnums=(4,))
    out = jax.block_until_ready(fwd(x, w1, w2, b2, dilation_rate))

    ref = _reference_forward(x, w1, w2, b2, dilation_rate)
    assert out.shape == (N, filters, T, H, W), out.shape
    max_err = float(jnp.max(jnp.abs(out - ref)))
    # f32 compute path: observed error is ~1e-5; tolerance leaves headroom for
    # per-generation MXU f32 pass-precision differences.
    assert jnp.allclose(out, ref, atol=2e-2, rtol=2e-2), max_err

    print("KERNEL_OK")
</pallas_src>

<mosaic_0001>
module attributes {stable_mosaic.version = 11 : i64} {
  func.func @kernel(%arg0: i32, %arg1: i32, %arg2: memref<1x12x4x256xf32, #tpu.memory_space<vmem>>, %arg3: memref<8x108xf32, #tpu.memory_space<vmem>>, %arg4: memref<8x1xf32, #tpu.memory_space<vmem>>, %arg5: memref<9x1x256xf32, #tpu.memory_space<vmem>>, %arg6: memref<1x8x1024xf32, #tpu.memory_space<vmem>>) attributes {dimension_semantics = [#tpu.dimension_semantics<parallel>, #tpu.dimension_semantics<parallel>], iteration_bounds = array<i64: 2, 2>, scalar_prefetch = 0 : i64, scratch_operands = 0 : i64, tpu.core_type = #tpu.core_type<tc>, window_params = [{transform_indices = @transform_0, window_bounds = array<i64: 1, 12, 4, 256>}, {pipeline_mode = #tpu.pipeline_mode<synchronous>, transform_indices = @transform_1, window_bounds = array<i64: 8, 108>}, {pipeline_mode = #tpu.pipeline_mode<synchronous>, transform_indices = @transform_2, window_bounds = array<i64: 8, 1>}, {pipeline_mode = #tpu.pipeline_mode<synchronous>, transform_indices = @transform_3, window_bounds = array<i64: 9, 1, 256>}, {transform_indices = @transform_4, window_bounds = array<i64: 1, 8, 1024>}]} {
    %c4_i32 = arith.constant 4 : i32
    %0 = arith.muli %arg1, %c4_i32 : i32
    %c0 = arith.constant 0 : index
    %c0_0 = arith.constant 0 : index
    %1 = vector.load %arg3[%c0, %c0_0] : memref<8x108xf32, #tpu.memory_space<vmem>>, vector<8x108xf32>
    %c0_1 = arith.constant 0 : index
    %c0_2 = arith.constant 0 : index
    %2 = vector.load %arg4[%c0_1, %c0_2] : memref<8x1xf32, #tpu.memory_space<vmem>>, vector<8x1xf32>
    %c0_i32 = arith.constant 0 : i32
    %3 = arith.addi %0, %c0_i32 : i32
    %c0_i32_3 = arith.constant 0 : i32
    %4 = arith.addi %3, %c0_i32_3 : i32
    %c0_4 = arith.constant 0 : index
    %5 = arith.index_cast %4 : i32 to index
    %c0_5 = arith.constant 0 : index
    %c0_6 = arith.constant 0 : index
    %6 = vector.load %arg2[%c0_4, %5, %c0_5, %c0_6] : memref<1x12x4x256xf32, #tpu.memory_space<vmem>>, vector<1x1x4x256xf32>
    %7 = vector.shape_cast %6 : vector<1x1x4x256xf32> to vector<4x256xf32>
    %c0_i32_7 = arith.constant 0 : i32
    %8 = arith.addi %0, %c0_i32_7 : i32
    %c2_i32 = arith.constant 2 : i32
    %9 = arith.addi %8, %c2_i32 : i32
    %c0_8 = arith.constant 0 : index
    %10 = arith.index_cast %9 : i32 to index
    %c0_9 = arith.constant 0 : index
    %c0_10 = arith.constant 0 : index
    %11 = vector.load %arg2[%c0_8, %10, %c0_9, %c0_10] : memref<1x12x4x256xf32, #tpu.memory_space<vmem>>, vector<1x1x4x256xf32>
    %12 = vector.shape_cast %11 : vector<1x1x4x256xf32> to vector<4x256xf32>
    %c0_i32_11 = arith.constant 0 : i32
    %13 = arith.addi %0, %c0_i32_11 : i32
    %c4_i32_12 = arith.constant 4 : i32
    %14 = arith.addi %13, %c4_i32_12 : i32
    %c0_13 = arith.constant 0 : index
    %15 = arith.index_cast %14 : i32 to index
    %c0_14 = arith.constant 0 : index
    %c0_15 = arith.constant 0 : index
    %16 = vector.load %arg2[%c0_13, %15, %c0_14, %c0_15] : memref<1x12x4x256xf32, #tpu.memory_space<vmem>>, vector<1x1x4x256xf32>
    %17 = vector.shape_cast %16 : vector<1x1x4x256xf32> to vector<4x256xf32>
    %18 = tpu.concatenate %7, %12, %17 in 0 : vector<4x256xf32>, vector<4x256xf32>, vector<4x256xf32> -> vector<12x256xf32>
    %19 = vector.extract_strided_slice %18 {offsets = [0, 239], sizes = [12, 17], strides = [1, 1]} : vector<12x256xf32> to vector<12x17xf32>
    %20 = vector.extract_strided_slice %18 {offsets = [0, 0], sizes = [12, 239], strides = [1, 1]} : vector<12x256xf32> to vector<12x239xf32>
    %21 = tpu.concatenate %19, %20 in 1 : vector<12x17xf32>, vector<12x239xf32> -> vector<12x256xf32>
    %c0_16 = arith.constant 0 : index
    %c0_17 = arith.constant 0 : index
    %c0_18 = arith.constant 0 : index
    %22 = vector.load %arg5[%c0_16, %c0_17, %c0_18] : memref<9x1x256xf32, #tpu.memory_space<vmem>>, vector<1x1x256xf32>
    %23 = vector.shape_cast %22 : vector<1x1x256xf32> to vector<1x256xf32>
    %24 = vector.broadcast %23 : vector<1x256xf32> to vector<12x256xf32>
    %25 = arith.mulf %21, %24 : vector<12x256xf32>
    %26 = vector.extract_strided_slice %18 {offsets = [0, 240], sizes = [12, 16], strides = [1, 1]} : vector<12x256xf32> to vector<12x16xf32>
    %27 = vector.extract_strided_slice %18 {offsets = [0, 0], sizes = [12, 240], strides = [1, 1]} : vector<12x256xf32> to vector<12x240xf32>
    %28 = tpu.concatenate %26, %27 in 1 : vector<12x16xf32>, vector<12x240xf32> -> vector<12x256xf32>
    %c1 = arith.constant 1 : index
    %c0_19 = arith.constant 0 : index
    %c0_20 = arith.constant 0 : index
    %29 = vector.load %arg5[%c1, %c0_19, %c0_20] : memref<9x1x256xf32, #tpu.memory_space<vmem>>, vector<1x1x256xf32>
    %30 = vector.shape_cast %29 : vector<1x1x256xf32> to vector<1x256xf32>
    %31 = vector.broadcast %30 : vector<1x256xf32> to vector<12x256xf32>
    %32 = arith.mulf %28, %31 : vector<12x256xf32>
    %33 = vector.extract_strided_slice %18 {offsets = [0, 241], sizes = [12, 15], strides = [1, 1]} : vector<12x256xf32> to vector<12x15xf32>
    %34 = vector.extract_strided_slice %18 {offsets = [0, 0], sizes = [12, 241], strides = [1, 1]} : vector<12x256xf32> to vector<12x241xf32>
    %35 = tpu.concatenate %33, %34 in 1 : vector<12x15xf32>, vector<12x241xf32> -> vector<12x256xf32>
    %c2 = arith.constant 2 : index
    %c0_21 = arith.constant 0 : index
    %c0_22 = arith.constant 0 : index
    %36 = vector.load %arg5[%c2, %c0_21, %c0_22] : memref<9x1x256xf32, #tpu.memory_space<vmem>>, vector<1x1x256xf32>
    %37 = vector.shape_cast %36 : vector<1x1x256xf32> to vector<1x256xf32>
    %38 = vector.broadcast %37 : vector<1x256xf32> to vector<12x256xf32>
    %39 = arith.mulf %35, %38 : vector<12x256xf32>
    %40 = vector.extract_strided_slice %18 {offsets = [0, 255], sizes = [12, 1], strides = [1, 1]} : vector<12x256xf32> to vector<12x1xf32>
    %41 = vector.extract_strided_slice %18 {offsets = [0, 0], sizes = [12, 255], strides = [1, 1]} : vector<12x256xf32> to vector<12x255xf32>
    %42 = tpu.concatenate %40, %41 in 1 : vector<12x1xf32>, vector<12x255xf32> -> vector<12x256xf32>
    %c3 = arith.constant 3 : index
    %c0_23 = arith.constant 0 : index
    %c0_24 = arith.constant 0 : index
    %43 = vector.load %arg5[%c3, %c0_23, %c0_24] : memref<9x1x256xf32, #tpu.memory_space<vmem>>, vector<1x1x256xf32>
    %44 = vector.shape_cast %43 : vector<1x1x256xf32> to vector<1x256xf32>
    %45 = vector.broadcast %44 : vector<1x256xf32> to vector<12x256xf32>
    %46 = arith.mulf %42, %45 : vector<12x256xf32>
    %47 = vector.extract_strided_slice %18 {offsets = [0, 1], sizes = [12, 255], strides = [1, 1]} : vector<12x256xf32> to vector<12x255xf32>
    %48 = vector.extract_strided_slice %18 {offsets = [0, 0], sizes = [12, 1], strides = [1, 1]} : vector<12x256xf32> to vector<12x1xf32>
    %49 = tpu.concatenate %47, %48 in 1 : vector<12x255xf32>, vector<12x1xf32> -> vector<12x256xf32>
    %c5 = arith.constant 5 : index
    %c0_25 = arith.constant 0 : index
    %c0_26 = arith.constant 0 : index
    %50 = vector.load %arg5[%c5, %c0_25, %c0_26] : memref<9x1x256xf32, #tpu.memory_space<vmem>>, vector<1x1x256xf32>
    %51 = vector.shape_cast %50 : vector<1x1x256xf32> to vector<1x256xf32>
    %52 = vector.broadcast %51 : vector<1x256xf32> to vector<12x256xf32>
    %53 = arith.mulf %49, %52 : vector<12x256xf32>
    %54 = vector.extract_strided_slice %18 {offsets = [0, 15], sizes = [12, 241], strides = [1, 1]} : vector<12x256xf32> to vector<12x241xf32>
    %55 = vector.extract_strided_slice %18 {offsets = [0, 0], sizes = [12, 15], strides = [1, 1]} : vector<12x256xf32> to vector<12x15xf32>
    %56 = tpu.concatenate %54, %55 in 1 : vector<12x241xf32>, vector<12x15xf32> -> vector<12x256xf32>
    %c6 = arith.constant 6 : index
    %c0_27 = arith.constant 0 : index
    %c0_28 = arith.constant 0 : index
    %57 = vector.load %arg5[%c6, %c0_27, %c0_28] : memref<9x1x256xf32, #tpu.memory_space<vmem>>, vector<1x1x256xf32>
    %58 = vector.shape_cast %57 : vector<1x1x256xf32> to vector<1x256xf32>
    %59 = vector.broadcast %58 : vector<1x256xf32> to vector<12x256xf32>
    %60 = arith.mulf %56, %59 : vector<12x256xf32>
    %61 = vector.extract_strided_slice %18 {offsets = [0, 16], sizes = [12, 240], strides = [1, 1]} : vector<12x256xf32> to vector<12x240xf32>
    %62 = vector.extract_strided_slice %18 {offsets = [0, 0], sizes = [12, 16], strides = [1, 1]} : vector<12x256xf32> to vector<12x16xf32>
    %63 = tpu.concatenate %61, %62 in 1 : vector<12x240xf32>, vector<12x16xf32> -> vector<12x256xf32>
    %c7 = arith.constant 7 : index
    %c0_29 = arith.constant 0 : index
    %c0_30 = arith.constant 0 : index
    %64 = vector.load %arg5[%c7, %c0_29, %c0_30] : memref<9x1x256xf32, #tpu.memory_space<vmem>>, vector<1x1x256xf32>
    %65 = vector.shape_cast %64 : vector<1x1x256xf32> to vector<1x256xf32>
    %66 = vector.broadcast %65 : vector<1x256xf32> to vector<12x256xf32>
    %67 = arith.mulf %63, %66 : vector<12x256xf32>
    %68 = vector.extract_strided_slice %18 {offsets = [0, 17], sizes = [12, 239], strides = [1, 1]} : vector<12x256xf32> to vector<12x239xf32>
    %69 = vector.extract_strided_slice %18 {offsets = [0, 0], sizes = [12, 17], strides = [1, 1]} : vector<12x256xf32> to vector<12x17xf32>
    %70 = tpu.concatenate %68, %69 in 1 : vector<12x239xf32>, vector<12x17xf32> -> vector<12x256xf32>
    %c8 = arith.constant 8 : index
    %c0_31 = arith.constant 0 : index
    %c0_32 = arith.constant 0 : index
    %71 = vector.load %arg5[%c8, %c0_31, %c0_32] : memref<9x1x256xf32, #tpu.memory_space<vmem>>, vector<1x1x256xf32>
    %72 = vector.shape_cast %71 : vector<1x1x256xf32> to vector<1x256xf32>
    %73 = vector.broadcast %72 : vector<1x256xf32> to vector<12x256xf32>
    %74 = arith.mulf %70, %73 : vector<12x256xf32>
    %75 = tpu.concatenate %25, %32, %39, %46, %18, %53, %60, %67, %74 in 0 : vector<12x256xf32>, vector<12x256xf32>, vector<12x256xf32>, vector<12x256xf32>, vector<12x256xf32>, vector<12x256xf32>, vector<12x256xf32>, vector<12x256xf32>, vector<12x256xf32> -> vector<108x256xf32>
    %cst = arith.constant dense<0.000000e+00> : vector<8x256xf32>
    %76 = tpu.matmul %1, %75, %cst {dimension_numbers = #tpu.dot_dimension_numbers<[1], [0], [0], [1], [0, 0, 1, 1], [], []>} : vector<8x108xf32>, vector<108x256xf32>, vector<8x256xf32> -> vector<8x256xf32>
    %77 = vector.broadcast %2 : vector<8x1xf32> to vector<8x256xf32>
    %78 = arith.addf %76, %77 : vector<8x256xf32>
    %c0_33 = arith.constant 0 : index
    %c0_34 = arith.constant 0 : index
    %c0_35 = arith.constant 0 : index
    %79 = vector.load %arg6[%c0_33, %c0_34, %c0_35] : memref<1x8x1024xf32, #tpu.memory_space<vmem>>, vector<1x8x256xf32>
    %80 = vector.shape_cast %79 : vector<1x8x256xf32> to vector<8x256xf32>
    %81 = vector.shape_cast %78 : vector<8x256xf32> to vector<1x8x256xf32>
    tpu.vector_store %arg6[%c0_33, %c0_34, %c0_35], %81 {strides = array<i32>} : memref<1x8x1024xf32, #tpu.memory_space<vmem>>, vector<1x8x256xf32>,
    %c1_i32 = arith.constant 1 : i32
    %82 = arith.addi %0, %c1_i32 : i32
    %c0_i32_36 = arith.constant 0 : i32
    %83 = arith.addi %82, %c0_i32_36 : i32
    %c0_37 = arith.constant 0 : index
    %84 = arith.index_cast %83 : i32 to index
    %c0_38 = arith.constant 0 : index
    %c0_39 = arith.constant 0 : index
    %85 = vector.load %arg2[%c0_37, %84, %c0_38, %c0_39] : memref<1x12x4x256xf32, #tpu.memory_space<vmem>>, vector<1x1x4x256xf32>
    %86 = vector.shape_cast %85 : vector<1x1x4x256xf32> to vector<4x256xf32>
    %c1_i32_40 = arith.constant 1 : i32
    %87 = arith.addi %0, %c1_i32_40 : i32
    %c2_i32_41 = arith.constant 2 : i32
    %88 = arith.addi %87, %c2_i32_41 : i32
    %c0_42 = arith.constant 0 : index
    %89 = arith.index_cast %88 : i32 to index
    %c0_43 = arith.constant 0 : index
    %c0_44 = arith.constant 0 : index
    %90 = vector.load %arg2[%c0_42, %89, %c0_43, %c0_44] : memref<1x12x4x256xf32, #tpu.memory_space<vmem>>, vector<1x1x4x256xf32>
    %91 = vector.shape_cast %90 : vector<1x1x4x256xf32> to vector<4x256xf32>
    %c1_i32_45 = arith.constant 1 : i32
    %92 = arith.addi %0, %c1_i32_45 : i32
    %c4_i32_46 = arith.constant 4 : i32
    %93 = arith.addi %92, %c4_i32_46 : i32
    %c0_47 = arith.constant 0 : index
    %94 = arith.index_cast %93 : i32 to index
    %c0_48 = arith.constant 0 : index
    %c0_49 = arith.constant 0 : index
    %95 = vector.load %arg2[%c0_47, %94, %c0_48, %c0_49] : memref<1x12x4x256xf32, #tpu.memory_space<vmem>>, vector<1x1x4x256xf32>
    %96 = vector.shape_cast %95 : vector<1x1x4x256xf32> to vector<4x256xf32>
    %97 = tpu.concatenate %86, %91, %96 in 0 : vector<4x256xf32>, vector<4x256xf32>, vector<4x256xf32> -> vector<12x256xf32>
    %98 = vector.extract_strided_slice %97 {offsets = [0, 239], sizes = [12, 17], strides = [1, 1]} : vector<12x256xf32> to vector<12x17xf32>
    %99 = vector.extract_strided_slice %97 {offsets = [0, 0], sizes = [12, 239], strides = [1, 1]} : vector<12x256xf32> to vector<12x239xf32>
    %100 = tpu.concatenate %98, %99 in 1 : vector<12x17xf32>, vector<12x239xf32> -> vector<12x256xf32>
    %c0_50 = arith.constant 0 : index
    %c0_51 = arith.constant 0 : index
    %c0_52 = arith.constant 0 : index
    %101 = vector.load %arg5[%c0_50, %c0_51, %c0_52] : memref<9x1x256xf32, #tpu.memory_space<vmem>>, vector<1x1x256xf32>
    %102 = vector.shape_cast %101 : vector<1x1x256xf32> to vector<1x256xf32>
    %103 = vector.broadcast %102 : vector<1x256xf32> to vector<12x256xf32>
    %104 = arith.mulf %100, %103 : vector<12x256xf32>
    %105 = vector.extract_strided_slice %97 {offsets = [0, 240], sizes = [12, 16], strides = [1, 1]} : vector<12x256xf32> to vector<12x16xf32>
    %106 = vector.extract_strided_slice %97 {offsets = [0, 0], sizes = [12, 240], strides = [1, 1]} : vector<12x256xf32> to vector<12x240xf32>
    %107 = tpu.concatenate %105, %106 in 1 : vector<12x16xf32>, vector<12x240xf32> -> vector<12x256xf32>
    %c1_53 = arith.constant 1 : index
    %c0_54 = arith.constant 0 : index
    %c0_55 = arith.constant 0 : index
    %108 = vector.load %arg5[%c1_53, %c0_54, %c0_55] : memref<9x1x256xf32, #tpu.memory_space<vmem>>, vector<1x1x256xf32>
    %109 = vector.shape_cast %108 : vector<1x1x256xf32> to vector<1x256xf32>
    %110 = vector.broadcast %109 : vector<1x256xf32> to vector<12x256xf32>
    %111 = arith.mulf %107, %110 : vector<12x256xf32>
    %112 = vector.extract_strided_slice %97 {offsets = [0, 241], sizes = [12, 15], strides = [1, 1]} : vector<12x256xf32> to vector<12x15xf32>
    %113 = vector.extract_strided_slice %97 {offsets = [0, 0], sizes = [12, 241], strides = [1, 1]} : vector<12x256xf32> to vector<12x241xf32>
    %114 = tpu.concatenate %112, %113 in 1 : vector<12x15xf32>, vector<12x241xf32> -> vector<12x256xf32>
    %c2_56 = arith.constant 2 : index
    %c0_57 = arith.constant 0 : index
    %c0_58 = arith.constant 0 : index
    %115 = vector.load %arg5[%c2_56, %c0_57, %c0_58] : memref<9x1x256xf32, #tpu.memory_space<vmem>>, vector<1x1x256xf32>
    %116 = vector.shape_cast %115 : vector<1x1x256xf32> to vector<1x256xf32>
    %117 = vector.broadcast %116 : vector<1x256xf32> to vector<12x256xf32>
    %118 = arith.mulf %114, %117 : vector<12x256xf32>
    %119 = vector.extract_strided_slice %97 {offsets = [0, 255], sizes = [12, 1], strides = [1, 1]} : vector<12x256xf32> to vector<12x1xf32>
    %120 = vector.extract_strided_slice %97 {offsets = [0, 0], sizes = [12, 255], strides = [1, 1]} : vector<12x256xf32> to vector<12x255xf32>
    %121 = tpu.concatenate %119, %120 in 1 : vector<12x1xf32>, vector<12x255xf32> -> vector<12x256xf32>
    %c3_59 = arith.constant 3 : index
    %c0_60 = arith.constant 0 : index
    %c0_61 = arith.constant 0 : index
    %122 = vector.load %arg5[%c3_59, %c0_60, %c0_61] : memref<9x1x256xf32, #tpu.memory_space<vmem>>, vector<1x1x256xf32>
    %123 = vector.shape_cast %122 : vector<1x1x256xf32> to vector<1x256xf32>
    %124 = vector.broadcast %123 : vector<1x256xf32> to vector<12x256xf32>
    %125 = arith.mulf %121, %124 : vector<12x256xf32>
    %126 = vector.extract_strided_slice %97 {offsets = [0, 1], sizes = [12, 255], strides = [1, 1]} : vector<12x256xf32> to vector<12x255xf32>
    %127 = vector.extract_strided_slice %97 {offsets = [0, 0], sizes = [12, 1], strides = [1, 1]} : vector<12x256xf32> to vector<12x1xf32>
    %128 = tpu.concatenate %126, %127 in 1 : vector<12x255xf32>, vector<12x1xf32> -> vector<12x256xf32>
    %c5_62 = arith.constant 5 : index
    %c0_63 = arith.constant 0 : index
    %c0_64 = arith.constant 0 : index
    %129 = vector.load %arg5[%c5_62, %c0_63, %c0_64] : memref<9x1x256xf32, #tpu.memory_space<vmem>>, vector<1x1x256xf32>
    %130 = vector.shape_cast %129 : vector<1x1x256xf32> to vector<1x256xf32>
    %131 = vector.broadcast %130 : vector<1x256xf32> to vector<12x256xf32>
    %132 = arith.mulf %128, %131 : vector<12x256xf32>
    %133 = vector.extract_strided_slice %97 {offsets = [0, 15], sizes = [12, 241], strides = [1, 1]} : vector<12x256xf32> to vector<12x241xf32>
    %134 = vector.extract_strided_slice %97 {offsets = [0, 0], sizes = [12, 15], strides = [1, 1]} : vector<12x256xf32> to vector<12x15xf32>
    %135 = tpu.concatenate %133, %134 in 1 : vector<12x241xf32>, vector<12x15xf32> -> vector<12x256xf32>
    %c6_65 = arith.constant 6 : index
    %c0_66 = arith.constant 0 : index
    %c0_67 = arith.constant 0 : index
    %136 = vector.load %arg5[%c6_65, %c0_66, %c0_67] : memref<9x1x256xf32, #tpu.memory_space<vmem>>, vector<1x1x256xf32>
    %137 = vector.shape_cast %136 : vector<1x1x256xf32> to vector<1x256xf32>
    %138 = vector.broadcast %137 : vector<1x256xf32> to vector<12x256xf32>
    %139 = arith.mulf %135, %138 : vector<12x256xf32>
    %140 = vector.extract_strided_slice %97 {offsets = [0, 16], sizes = [12, 240], strides = [1, 1]} : vector<12x256xf32> to vector<12x240xf32>
    %141 = vector.extract_strided_slice %97 {offsets = [0, 0], sizes = [12, 16], strides = [1, 1]} : vector<12x256xf32> to vector<12x16xf32>
    %142 = tpu.concatenate %140, %141 in 1 : vector<12x240xf32>, vector<12x16xf32> -> vector<12x256xf32>
    %c7_68 = arith.constant 7 : index
    %c0_69 = arith.constant 0 : index
    %c0_70 = arith.constant 0 : index
    %143 = vector.load %arg5[%c7_68, %c0_69, %c0_70] : memref<9x1x256xf32, #tpu.memory_space<vmem>>, vector<1x1x256xf32>
    %144 = vector.shape_cast %143 : vector<1x1x256xf32> to vector<1x256xf32>
    %145 = vector.broadcast %144 : vector<1x256xf32> to vector<12x256xf32>
    %146 = arith.mulf %142, %145 : vector<12x256xf32>
    %147 = vector.extract_strided_slice %97 {offsets = [0, 17], sizes = [12, 239], strides = [1, 1]} : vector<12x256xf32> to vector<12x239xf32>
    %148 = vector.extract_strided_slice %97 {offsets = [0, 0], sizes = [12, 17], strides = [1, 1]} : vector<12x256xf32> to vector<12x17xf32>
    %149 = tpu.concatenate %147, %148 in 1 : vector<12x239xf32>, vector<12x17xf32> -> vector<12x256xf32>
    %c8_71 = arith.constant 8 : index
    %c0_72 = arith.constant 0 : index
    %c0_73 = arith.constant 0 : index
    %150 = vector.load %arg5[%c8_71, %c0_72, %c0_73] : memref<9x1x256xf32, #tpu.memory_space<vmem>>, vector<1x1x256xf32>
    %151 = vector.shape_cast %150 : vector<1x1x256xf32> to vector<1x256xf32>
    %152 = vector.broadcast %151 : vector<1x256xf32> to vector<12x256xf32>
    %153 = arith.mulf %149, %152 : vector<12x256xf32>
    %154 = tpu.concatenate %104, %111, %118, %125, %97, %132, %139, %146, %153 in 0 : vector<12x256xf32>, vector<12x256xf32>, vector<12x256xf32>, vector<12x256xf32>, vector<12x256xf32>, vector<12x256xf32>, vector<12x256xf32>, vector<12x256xf32>, vector<12x256xf32> -> vector<108x256xf32>
    %cst_74 = arith.constant dense<0.000000e+00> : vector<8x256xf32>
    %155 = tpu.matmul %1, %154, %cst_74 {dimension_numbers = #tpu.dot_dimension_numbers<[1], [0], [0], [1], [0, 0, 1, 1], [], []>} : vector<8x108xf32>, vector<108x256xf32>, vector<8x256xf32> -> vector<8x256xf32>
    %156 = vector.broadcast %2 : vector<8x1xf32> to vector<8x256xf32>
    %157 = arith.addf %155, %156 : vector<8x256xf32>
    %c0_75 = arith.constant 0 : index
    %c0_76 = arith.constant 0 : index
    %c256 = arith.constant 256 : index
    %158 = vector.load %arg6[%c0_75, %c0_76, %c256] : memref<1x8x1024xf32, #tpu.memory_space<vmem>>, vector<1x8x256xf32>
    %159 = vector.shape_cast %158 : vector<1x8x256xf32> to vector<8x256xf32>
    %160 = vector.shape_cast %157 : vector<8x256xf32> to vector<1x8x256xf32>
    tpu.vector_store %arg6[%c0_75, %c0_76, %c256], %160 {strides = array<i32>} : memref<1x8x1024xf32, #tpu.memory_space<vmem>>, vector<1x8x256xf32>,
    %c2_i32_77 = arith.constant 2 : i32
    %161 = arith.addi %0, %c2_i32_77 : i32
    %c0_i32_78 = arith.constant 0 : i32
    %162 = arith.addi %161, %c0_i32_78 : i32
    %c0_79 = arith.constant 0 : index
    %163 = arith.index_cast %162 : i32 to index
    %c0_80 = arith.constant 0 : index
    %c0_81 = arith.constant 0 : index
    %164 = vector.load %arg2[%c0_79, %163, %c0_80, %c0_81] : memref<1x12x4x256xf32, #tpu.memory_space<vmem>>, vector<1x1x4x256xf32>
    %165 = vector.shape_cast %164 : vector<1x1x4x256xf32> to vector<4x256xf32>
    %c2_i32_82 = arith.constant 2 : i32
    %166 = arith.addi %0, %c2_i32_82 : i32
    %c2_i32_83 = arith.constant 2 : i32
    %167 = arith.addi %166, %c2_i32_83 : i32
    %c0_84 = arith.constant 0 : index
    %168 = arith.index_cast %167 : i32 to index
    %c0_85 = arith.constant 0 : index
    %c0_86 = arith.constant 0 : index
    %169 = vector.load %arg2[%c0_84, %168, %c0_85, %c0_86] : memref<1x12x4x256xf32, #tpu.memory_space<vmem>>, vector<1x1x4x256xf32>
    %170 = vector.shape_cast %169 : vector<1x1x4x256xf32> to vector<4x256xf32>
    %c2_i32_87 = arith.constant 2 : i32
    %171 = arith.addi %0, %c2_i32_87 : i32
    %c4_i32_88 = arith.constant 4 : i32
    %172 = arith.addi %171, %c4_i32_88 : i32
    %c0_89 = arith.constant 0 : index
    %173 = arith.index_cast %172 : i32 to index
    %c0_90 = arith.constant 0 : index
    %c0_91 = arith.constant 0 : index
    %174 = vector.load %arg2[%c0_89, %173, %c0_90, %c0_91] : memref<1x12x4x256xf32, #tpu.memory_space<vmem>>, vector<1x1x4x256xf32>
    %175 = vector.shape_cast %174 : vector<1x1x4x256xf32> to vector<4x256xf32>
    %176 = tpu.concatenate %165, %170, %175 in 0 : vector<4x256xf32>, vector<4x256xf32>, vector<4x256xf32> -> vector<12x256xf32>
    %177 = vector.extract_strided_slice %176 {offsets = [0, 239], sizes = [12, 17], strides = [1, 1]} : vector<12x256xf32> to vector<12x17xf32>
    %178 = vector.extract_strided_slice %176 {offsets = [0, 0], sizes = [12, 239], strides = [1, 1]} : vector<12x256xf32> to vector<12x239xf32>
    %179 = tpu.concatenate %177, %178 in 1 : vector<12x17xf32>, vector<12x239xf32> -> vector<12x256xf32>
    %c0_92 = arith.constant 0 : index
    %c0_93 = arith.constant 0 : index
    %c0_94 = arith.constant 0 : index
    %180 = vector.load %arg5[%c0_92, %c0_93, %c0_94] : memref<9x1x256xf32, #tpu.memory_space<vmem>>, vector<1x1x256xf32>
    %181 = vector.shape_cast %180 : vector<1x1x256xf32> to vector<1x256xf32>
    %182 = vector.broadcast %181 : vector<1x256xf32> to vector<12x256xf32>
    %183 = arith.mulf %179, %182 : vector<12x256xf32>
    %184 = vector.extract_strided_slice %176 {offsets = [0, 240], sizes = [12, 16], strides = [1, 1]} : vector<12x256xf32> to vector<12x16xf32>
    %185 = vector.extract_strided_slice %176 {offsets = [0, 0], sizes = [12, 240], strides = [1, 1]} : vector<12x256xf32> to vector<12x240xf32>
    %186 = tpu.concatenate %184, %185 in 1 : vector<12x16xf32>, vector<12x240xf32> -> vector<12x256xf32>
    %c1_95 = arith.constant 1 : index
    %c0_96 = arith.constant 0 : index
    %c0_97 = arith.constant 0 : index
    %187 = vector.load %arg5[%c1_95, %c0_96, %c0_97] : memref<9x1x256xf32, #tpu.memory_space<vmem>>, vector<1x1x256xf32>
    %188 = vector.shape_cast %187 : vector<1x1x256xf32> to vector<1x256xf32>
    %189 = vector.broadcast %188 : vector<1x256xf32> to vector<12x256xf32>
    %190 = arith.mulf %186, %189 : vector<12x256xf32>
    %191 = vector.extract_strided_slice %176 {offsets = [0, 241], sizes = [12, 15], strides = [1, 1]} : vector<12x256xf32> to vector<12x15xf32>
    %192 = vector.extract_strided_slice %176 {offsets = [0, 0], sizes = [12, 241], strides = [1, 1]} : vector<12x256xf32> to vector<12x241xf32>
    %193 = tpu.concatenate %191, %192 in 1 : vector<12x15xf32>, vector<12x241xf32> -> vector<12x256xf32>
    %c2_98 = arith.constant 2 : index
    %c0_99 = arith.constant 0 : index
    %c0_100 = arith.constant 0 : index
    %194 = vector.load %arg5[%c2_98, %c0_99, %c0_100] : memref<9x1x256xf32, #tpu.memory_space<vmem>>, vector<1x1x256xf32>
    %195 = vector.shape_cast %194 : vector<1x1x256xf32> to vector<1x256xf32>
    %196 = vector.broadcast %195 : vector<1x256xf32> to vector<12x256xf32>
    %197 = arith.mulf %193, %196 : vector<12x256xf32>
    %198 = vector.extract_strided_slice %176 {offsets = [0, 255], sizes = [12, 1], strides = [1, 1]} : vector<12x256xf32> to vector<12x1xf32>
    %199 = vector.extract_strided_slice %176 {offsets = [0, 0], sizes = [12, 255], strides = [1, 1]} : vector<12x256xf32> to vector<12x255xf32>
    %200 = tpu.concatenate %198, %199 in 1 : vector<12x1xf32>, vector<12x255xf32> -> vector<12x256xf32>
    %c3_101 = arith.constant 3 : index
    %c0_102 = arith.constant 0 : index
    %c0_103 = arith.constant 0 : index
    %201 = vector.load %arg5[%c3_101, %c0_102, %c0_103] : memref<9x1x256xf32, #tpu.memory_space<vmem>>, vector<1x1x256xf32>
    %202 = vector.shape_cast %201 : vector<1x1x256xf32> to vector<1x256xf32>
    %203 = vector.broadcast %202 : vector<1x256xf32> to vector<12x256xf32>
    %204 = arith.mulf %200, %203 : vector<12x256xf32>
    %205 = vector.extract_strided_slice %176 {offsets = [0, 1], sizes = [12, 255], strides = [1, 1]} : vector<12x256xf32> to vector<12x255xf32>
    %206 = vector.extract_strided_slice %176 {offsets = [0, 0], sizes = [12, 1], strides = [1, 1]} : vector<12x256xf32> to vector<12x1xf32>
    %207 = tpu.concatenate %205, %206 in 1 : vector<12x255xf32>, vector<12x1xf32> -> vector<12x256xf32>
    %c5_104 = arith.constant 5 : index
    %c0_105 = arith.constant 0 : index
    %c0_106 = arith.constant 0 : index
    %208 = vector.load %arg5[%c5_104, %c0_105, %c0_106] : memref<9x1x256xf32, #tpu.memory_space<vmem>>, vector<1x1x256xf32>
    %209 = vector.shape_cast %208 : vector<1x1x256xf32> to vector<1x256xf32>
    %210 = vector.broadcast %209 : vector<1x256xf32> to vector<12x256xf32>
    %211 = arith.mulf %207, %210 : vector<12x256xf32>
    %212 = vector.extract_strided_slice %176 {offsets = [0, 15], sizes = [12, 241], strides = [1, 1]} : vector<12x256xf32> to vector<12x241xf32>
    %213 = vector.extract_strided_slice %176 {offsets = [0, 0], sizes = [12, 15], strides = [1, 1]} : vector<12x256xf32> to vector<12x15xf32>
    %214 = tpu.concatenate %212, %213 in 1 : vector<12x241xf32>, vector<12x15xf32> -> vector<12x256xf32>
    %c6_107 = arith.constant 6 : index
    %c0_108 = arith.constant 0 : index
    %c0_109 = arith.constant 0 : index
    %215 = vector.load %arg5[%c6_107, %c0_108, %c0_109] : memref<9x1x256xf32, #tpu.memory_space<vmem>>, vector<1x1x256xf32>
    %216 = vector.shape_cast %215 : vector<1x1x256xf32> to vector<1x256xf32>
    %217 = vector.broadcast %216 : vector<1x256xf32> to vector<12x256xf32>
    %218 = arith.mulf %214, %217 : vector<12x256xf32>
    %219 = vector.extract_strided_slice %176 {offsets = [0, 16], sizes = [12, 240], strides = [1, 1]} : vector<12x256xf32> to vector<12x240xf32>
    %220 = vector.extract_strided_slice %176 {offsets = [0, 0], sizes = [12, 16], strides = [1, 1]} : vector<12x256xf32> to vector<12x16xf32>
    %221 = tpu.concatenate %219, %220 in 1 : vector<12x240xf32>, vector<12x16xf32> -> vector<12x256xf32>
    %c7_110 = arith.constant 7 : index
    %c0_111 = arith.constant 0 : index
    %c0_112 = arith.constant 0 : index
    %222 = vector.load %arg5[%c7_110, %c0_111, %c0_112] : memref<9x1x256xf32, #tpu.memory_space<vmem>>, vector<1x1x256xf32>
    %223 = vector.shape_cast %222 : vector<1x1x256xf32> to vector<1x256xf32>
    %224 = vector.broadcast %223 : vector<1x256xf32> to vector<12x256xf32>
    %225 = arith.mulf %221, %224 : vector<12x256xf32>
    %226 = vector.extract_strided_slice %176 {offsets = [0, 17], sizes = [12, 239], strides = [1, 1]} : vector<12x256xf32> to vector<12x239xf32>
    %227 = vector.extract_strided_slice %176 {offsets = [0, 0], sizes = [12, 17], strides = [1, 1]} : vector<12x256xf32> to vector<12x17xf32>
    %228 = tpu.concatenate %226, %227 in 1 : vector<12x239xf32>, vector<12x17xf32> -> vector<12x256xf32>
    %c8_113 = arith.constant 8 : index
    %c0_114 = arith.constant 0 : index
    %c0_115 = arith.constant 0 : index
    %229 = vector.load %arg5[%c8_113, %c0_114, %c0_115] : memref<9x1x256xf32, #tpu.memory_space<vmem>>, vector<1x1x256xf32>
    %230 = vector.shape_cast %229 : vector<1x1x256xf32> to vector<1x256xf32>
    %231 = vector.broadcast %230 : vector<1x256xf32> to vector<12x256xf32>
    %232 = arith.mulf %228, %231 : vector<12x256xf32>
    %233 = tpu.concatenate %183, %190, %197, %204, %176, %211, %218, %225, %232 in 0 : vector<12x256xf32>, vector<12x256xf32>, vector<12x256xf32>, vector<12x256xf32>, vector<12x256xf32>, vector<12x256xf32>, vector<12x256xf32>, vector<12x256xf32>, vector<12x256xf32> -> vector<108x256xf32>
    %cst_116 = arith.constant dense<0.000000e+00> : vector<8x256xf32>
    %234 = tpu.matmul %1, %233, %cst_116 {dimension_numbers = #tpu.dot_dimension_numbers<[1], [0], [0], [1], [0, 0, 1, 1], [], []>} : vector<8x108xf32>, vector<108x256xf32>, vector<8x256xf32> -> vector<8x256xf32>
    %235 = vector.broadcast %2 : vector<8x1xf32> to vector<8x256xf32>
    %236 = arith.addf %234, %235 : vector<8x256xf32>
    %c0_117 = arith.constant 0 : index
    %c0_118 = arith.constant 0 : index
    %c512 = arith.constant 512 : index
    %237 = vector.load %arg6[%c0_117, %c0_118, %c512] : memref<1x8x1024xf32, #tpu.memory_space<vmem>>, vector<1x8x256xf32>
    %238 = vector.shape_cast %237 : vector<1x8x256xf32> to vector<8x256xf32>
    %239 = vector.shape_cast %236 : vector<8x256xf32> to vector<1x8x256xf32>
    tpu.vector_store %arg6[%c0_117, %c0_118, %c512], %239 {strides = array<i32>} : memref<1x8x1024xf32, #tpu.memory_space<vmem>>, vector<1x8x256xf32>,
    %c3_i32 = arith.constant 3 : i32
    %240 = arith.addi %0, %c3_i32 : i32
    %c0_i32_119 = arith.constant 0 : i32
    %241 = arith.addi %240, %c0_i32_119 : i32
    %c0_120 = arith.constant 0 : index
    %242 = arith.index_cast %241 : i32 to index
    %c0_121 = arith.constant 0 : index
    %c0_122 = arith.constant 0 : index
    %243 = vector.load %arg2[%c0_120, %242, %c0_121, %c0_122] : memref<1x12x4x256xf32, #tpu.memory_space<vmem>>, vector<1x1x4x256xf32>
    %244 = vector.shape_cast %243 : vector<1x1x4x256xf32> to vector<4x256xf32>
    %c3_i32_123 = arith.constant 3 : i32
    %245 = arith.addi %0, %c3_i32_123 : i32
    %c2_i32_124 = arith.constant 2 : i32
    %246 = arith.addi %245, %c2_i32_124 : i32
    %c0_125 = arith.constant 0 : index
    %247 = arith.index_cast %246 : i32 to index
    %c0_126 = arith.constant 0 : index
    %c0_127 = arith.constant 0 : index
    %248 = vector.load %arg2[%c0_125, %247, %c0_126, %c0_127] : memref<1x12x4x256xf32, #tpu.memory_space<vmem>>, vector<1x1x4x256xf32>
    %249 = vector.shape_cast %248 : vector<1x1x4x256xf32> to vector<4x256xf32>
    %c3_i32_128 = arith.constant 3 : i32
    %250 = arith.addi %0, %c3_i32_128 : i32
    %c4_i32_129 = arith.constant 4 : i32
    %251 = arith.addi %250, %c4_i32_129 : i32
    %c0_130 = arith.constant 0 : index
    %252 = arith.index_cast %251 : i32 to index
    %c0_131 = arith.constant 0 : index
    %c0_132 = arith.constant 0 : index
    %253 = vector.load %arg2[%c0_130, %252, %c0_131, %c0_132] : memref<1x12x4x256xf32, #tpu.memory_space<vmem>>, vector<1x1x4x256xf32>
    %254 = vector.shape_cast %253 : vector<1x1x4x256xf32> to vector<4x256xf32>
    %255 = tpu.concatenate %244, %249, %254 in 0 : vector<4x256xf32>, vector<4x256xf32>, vector<4x256xf32> -> vector<12x256xf32>
    %256 = vector.extract_strided_slice %255 {offsets = [0, 239], sizes = [12, 17], strides = [1, 1]} : vector<12x256xf32> to vector<12x17xf32>
    %257 = vector.extract_strided_slice %255 {offsets = [0, 0], sizes = [12, 239], strides = [1, 1]} : vector<12x256xf32> to vector<12x239xf32>
    %258 = tpu.concatenate %256, %257 in 1 : vector<12x17xf32>, vector<12x239xf32> -> vector<12x256xf32>
    %c0_133 = arith.constant 0 : index
    %c0_134 = arith.constant 0 : index
    %c0_135 = arith.constant 0 : index
    %259 = vector.load %arg5[%c0_133, %c0_134, %c0_135] : memref<9x1x256xf32, #tpu.memory_space<vmem>>, vector<1x1x256xf32>
    %260 = vector.shape_cast %259 : vector<1x1x256xf32> to vector<1x256xf32>
    %261 = vector.broadcast %260 : vector<1x256xf32> to vector<12x256xf32>
    %262 = arith.mulf %258, %261 : vector<12x256xf32>
    %263 = vector.extract_strided_slice %255 {offsets = [0, 240], sizes = [12, 16], strides = [1, 1]} : vector<12x256xf32> to vector<12x16xf32>
    %264 = vector.extract_strided_slice %255 {offsets = [0, 0], sizes = [12, 240], strides = [1, 1]} : vector<12x256xf32> to vector<12x240xf32>
    %265 = tpu.concatenate %263, %264 in 1 : vector<12x16xf32>, vector<12x240xf32> -> vector<12x256xf32>
    %c1_136 = arith.constant 1 : index
    %c0_137 = arith.constant 0 : index
    %c0_138 = arith.constant 0 : index
    %266 = vector.load %arg5[%c1_136, %c0_137, %c0_138] : memref<9x1x256xf32, #tpu.memory_space<vmem>>, vector<1x1x256xf32>
    %267 = vector.shape_cast %266 : vector<1x1x256xf32> to vector<1x256xf32>
    %268 = vector.broadcast %267 : vector<1x256xf32> to vector<12x256xf32>
    %269 = arith.mulf %265, %268 : vector<12x256xf32>
    %270 = vector.extract_strided_slice %255 {offsets = [0, 241], sizes = [12, 15], strides = [1, 1]} : vector<12x256xf32> to vector<12x15xf32>
    %271 = vector.extract_strided_slice %255 {offsets = [0, 0], sizes = [12, 241], strides = [1, 1]} : vector<12x256xf32> to vector<12x241xf32>
    %272 = tpu.concatenate %270, %271 in 1 : vector<12x15xf32>, vector<12x241xf32> -> vector<12x256xf32>
    %c2_139 = arith.constant 2 : index
    %c0_140 = arith.constant 0 : index
    %c0_141 = arith.constant 0 : index
    %273 = vector.load %arg5[%c2_139, %c0_140, %c0_141] : memref<9x1x256xf32, #tpu.memory_space<vmem>>, vector<1x1x256xf32>
    %274 = vector.shape_cast %273 : vector<1x1x256xf32> to vector<1x256xf32>
    %275 = vector.broadcast %274 : vector<1x256xf32> to vector<12x256xf32>
    %276 = arith.mulf %272, %275 : vector<12x256xf32>
    %277 = vector.extract_strided_slice %255 {offsets = [0, 255], sizes = [12, 1], strides = [1, 1]} : vector<12x256xf32> to vector<12x1xf32>
    %278 = vector.extract_strided_slice %255 {offsets = [0, 0], sizes = [12, 255], strides = [1, 1]} : vector<12x256xf32> to vector<12x255xf32>
    %279 = tpu.concatenate %277, %278 in 1 : vector<12x1xf32>, vector<12x255xf32> -> vector<12x256xf32>
    %c3_142 = arith.constant 3 : index
    %c0_143 = arith.constant 0 : index
    %c0_144 = arith.constant 0 : index
    %280 = vector.load %arg5[%c3_142, %c0_143, %c0_144] : memref<9x1x256xf32, #tpu.memory_space<vmem>>, vector<1x1x256xf32>
    %281 = vector.shape_cast %280 : vector<1x1x256xf32> to vector<1x256xf32>
    %282 = vector.broadcast %281 : vector<1x256xf32> to vector<12x256xf32>
    %283 = arith.mulf %279, %282 : vector<12x256xf32>
    %284 = vector.extract_strided_slice %255 {offsets = [0, 1], sizes = [12, 255], strides = [1, 1]} : vector<12x256xf32> to vector<12x255xf32>
    %285 = vector.extract_strided_slice %255 {offsets = [0, 0], sizes = [12, 1], strides = [1, 1]} : vector<12x256xf32> to vector<12x1xf32>
    %286 = tpu.concatenate %284, %285 in 1 : vector<12x255xf32>, vector<12x1xf32> -> vector<12x256xf32>
    %c5_145 = arith.constant 5 : index
    %c0_146 = arith.constant 0 : index
    %c0_147 = arith.constant 0 : index
    %287 = vector.load %arg5[%c5_145, %c0_146, %c0_147] : memref<9x1x256xf32, #tpu.memory_space<vmem>>, vector<1x1x256xf32>
    %288 = vector.shape_cast %287 : vector<1x1x256xf32> to vector<1x256xf32>
    %289 = vector.broadcast %288 : vector<1x256xf32> to vector<12x256xf32>
    %290 = arith.mulf %286, %289 : vector<12x256xf32>
    %291 = vector.extract_strided_slice %255 {offsets = [0, 15], sizes = [12, 241], strides = [1, 1]} : vector<12x256xf32> to vector<12x241xf32>
    %292 = vector.extract_strided_slice %255 {offsets = [0, 0], sizes = [12, 15], strides = [1, 1]} : vector<12x256xf32> to vector<12x15xf32>
    %293 = tpu.concatenate %291, %292 in 1 : vector<12x241xf32>, vector<12x15xf32> -> vector<12x256xf32>
    %c6_148 = arith.constant 6 : index
    %c0_149 = arith.constant 0 : index
    %c0_150 = arith.constant 0 : index
    %294 = vector.load %arg5[%c6_148, %c0_149, %c0_150] : memref<9x1x256xf32, #tpu.memory_space<vmem>>, vector<1x1x256xf32>
    %295 = vector.shape_cast %294 : vector<1x1x256xf32> to vector<1x256xf32>
    %296 = vector.broadcast %295 : vector<1x256xf32> to vector<12x256xf32>
    %297 = arith.mulf %293, %296 : vector<12x256xf32>
    %298 = vector.extract_strided_slice %255 {offsets = [0, 16], sizes = [12, 240], strides = [1, 1]} : vector<12x256xf32> to vector<12x240xf32>
    %299 = vector.extract_strided_slice %255 {offsets = [0, 0], sizes = [12, 16], strides = [1, 1]} : vector<12x256xf32> to vector<12x16xf32>
    %300 = tpu.concatenate %298, %299 in 1 : vector<12x240xf32>, vector<12x16xf32> -> vector<12x256xf32>
    %c7_151 = arith.constant 7 : index
    %c0_152 = arith.constant 0 : index
    %c0_153 = arith.constant 0 : index
    %301 = vector.load %arg5[%c7_151, %c0_152, %c0_153] : memref<9x1x256xf32, #tpu.memory_space<vmem>>, vector<1x1x256xf32>
    %302 = vector.shape_cast %301 : vector<1x1x256xf32> to vector<1x256xf32>
    %303 = vector.broadcast %302 : vector<1x256xf32> to vector<12x256xf32>
    %304 = arith.mulf %300, %303 : vector<12x256xf32>
    %305 = vector.extract_strided_slice %255 {offsets = [0, 17], sizes = [12, 239], strides = [1, 1]} : vector<12x256xf32> to vector<12x239xf32>
    %306 = vector.extract_strided_slice %255 {offsets = [0, 0], sizes = [12, 17], strides = [1, 1]} : vector<12x256xf32> to vector<12x17xf32>
    %307 = tpu.concatenate %305, %306 in 1 : vector<12x239xf32>, vector<12x17xf32> -> vector<12x256xf32>
    %c8_154 = arith.constant 8 : index
    %c0_155 = arith.constant 0 : index
    %c0_156 = arith.constant 0 : index
    %308 = vector.load %arg5[%c8_154, %c0_155, %c0_156] : memref<9x1x256xf32, #tpu.memory_space<vmem>>, vector<1x1x256xf32>
    %309 = vector.shape_cast %308 : vector<1x1x256xf32> to vector<1x256xf32>
    %310 = vector.broadcast %309 : vector<1x256xf32> to vector<12x256xf32>
    %311 = arith.mulf %307, %310 : vector<12x256xf32>
    %312 = tpu.concatenate %262, %269, %276, %283, %255, %290, %297, %304, %311 in 0 : vector<12x256xf32>, vector<12x256xf32>, vector<12x256xf32>, vector<12x256xf32>, vector<12x256xf32>, vector<12x256xf32>, vector<12x256xf32>, vector<12x256xf32>, vector<12x256xf32> -> vector<108x256xf32>
    %cst_157 = arith.constant dense<0.000000e+00> : vector<8x256xf32>
    %313 = tpu.matmul %1, %312, %cst_157 {dimension_numbers = #tpu.dot_dimension_numbers<[1], [0], [0], [1], [0, 0, 1, 1], [], []>} : vector<8x108xf32>, vector<108x256xf32>, vector<8x256xf32> -> vector<8x256xf32>
    %314 = vector.broadcast %2 : vector<8x1xf32> to vector<8x256xf32>
    %315 = arith.addf %313, %314 : vector<8x256xf32>
    %c0_158 = arith.constant 0 : index
    %c0_159 = arith.constant 0 : index
    %c768 = arith.constant 768 : index
    %316 = vector.load %arg6[%c0_158, %c0_159, %c768] : memref<1x8x1024xf32, #tpu.memory_space<vmem>>, vector<1x8x256xf32>
    %317 = vector.shape_cast %316 : vector<1x8x256xf32> to vector<8x256xf32>
    %318 = vector.shape_cast %315 : vector<8x256xf32> to vector<1x8x256xf32>
    tpu.vector_store %arg6[%c0_158, %c0_159, %c768], %318 {strides = array<i32>} : memref<1x8x1024xf32, #tpu.memory_space<vmem>>, vector<1x8x256xf32>,
    return
  }
  func.func @transform_0(%arg0: i32, %arg1: i32) -> (i32, i32, i32, i32) {
    %c0_i32 = arith.constant 0 : i32
    %c0_i32_0 = arith.constant 0 : i32
    %c0_i32_1 = arith.constant 0 : i32
    %c0_i32_2 = arith.constant 0 : i32
    return %arg0, %c0_i32, %c0_i32_0, %c0_i32_1 : i32, i32, i32, i32
  }
  func.func @transform_1(%arg0: i32, %arg1: i32) -> (i32, i32) {
    %c0_i32 = arith.constant 0 : i32
    %c0_i32_0 = arith.constant 0 : i32
    %c0_i32_1 = arith.constant 0 : i32
    return %c0_i32, %c0_i32_0 : i32, i32
  }
  func.func @transform_2(%arg0: i32, %arg1: i32) -> (i32, i32) {
    %c0_i32 = arith.constant 0 : i32
    %c0_i32_0 = arith.constant 0 : i32
    %c0_i32_1 = arith.constant 0 : i32
    return %c0_i32, %c0_i32_0 : i32, i32
  }
  func.func @transform_3(%arg0: i32, %arg1: i32) -> (i32, i32, i32) {
    %c0_i32 = arith.constant 0 : i32
    %c0_i32_0 = arith.constant 0 : i32
    %c0_i32_1 = arith.constant 0 : i32
    %c0_i32_2 = arith.constant 0 : i32
    return %c0_i32, %c0_i32_0, %c0_i32_1 : i32, i32, i32
  }
  func.func @transform_4(%arg0: i32, %arg1: i32) -> (i32, i32, i32) {
    %c0_i32 = arith.constant 0 : i32
    %c0_i32_0 = arith.constant 0 : i32
    return %arg0, %c0_i32, %arg1 : i32, i32, i32
  }
}

</mosaic_0001>

<bundles_post_ra>
// kernel: conv3d_configurable_forward.1
= control target key start
LH: loop header
LB: loop body
LE: loop exit
PB: predicated region body
PF: predicated region fallthrough
CT: control target
= control target key end

     0   :  { %s2469_s15 = smov 0   ;;  %s2471_s16 = smov 0   ;;  %s3429_s0 = inlined_call_operand.vmem [shape: f32[2,12,4,256], index: 0, kind: input, shape index: {}]   ;;  %s3430_s1 = inlined_call_operand.vmem [shape: f32[8,108], index: 1, kind: input, shape index: {}]   ;;  %s3431_s2 = inlined_call_operand.vmem [shape: f32[8,1], index: 2, kind: input, shape index: {}]   ;;  %s3432_s3 = inlined_call_operand.vmem [shape: f32[9,1,256], index: 3, kind: input, shape index: {}]   ;;  %s3433_s4 = inlined_call_operand.vmem [shape: f32[2,8,2048], index: 4, kind: output, shape index: {}]  }
   0x1   :  { %s2473_s17 = smov 0   ;;  %s2475_s18 = smov 0  }
   0x2   :  { %s2477_s19 = smov 0  }
   0x3 LB: > { %s23_s20 = sadd.s32 1, %s2423_s17  ;;  %s26_s21 = sadd.s32 1, %s2427_s18  ;;  %s2431_s19 = sphi %s2477_s19, %s14_s19   ;;  %s2427_s18 = sphi %s2475_s18, %s3439_s18   ;;  %s2423_s17 = sphi %s2473_s17, %s3438_s17   ;;  %s2419_s16 = sphi %s2471_s16, %s3437_s16   ;;  %s2415_s15 = sphi %s2469_s15, %s3436_s15  }
   0x4   : > { %p24_p0 = scmp.ge.s32.totalorder %s23_s20, 2  ;;  %p2122_p1 = scmp.ge.s32.totalorder %s2431_s19, 1 }
   0x5   : > { %p176_p2 = scmp.lt.s32.totalorder %s2431_s19, 5 }
   0x6   : > { %s3441_s20 = smov (%p24_p0, %s23_s20), 0  ;;  %s3443_s21 = smov (!%p24_p0, %s26_s21), %s2427_s18 }
   0x7   : > { %p177_p3 = pnand %p2122_p1, %p176_p2  ;;  %p28_p4 = scmp.ge.s32.totalorder %s3443_s21, 2 }
   0x8   : > { %p206_p5 = scmp.lt.s32.totalorder (!%p177_p3), %s2419_s16, 1  ;;  %s2198_s23 = sshll.u32 (!%p177_p3), %s2415_s15, 5  ;;  %vm247_vm0 = vcmask (!%p177_p3), 1043456   ;;  %v273_v17 = vlaneseq (!%p177_p3)  ;;  %v271_v25 = vld [vmem:[%s3432_s3] sm:$0x3] (!%p177_p3)  ;;  %vm297_vm1 = vcmask (!%p177_p3), 130048  }
   0x9   : > { %s3445_s21 = smov (%p28_p4, %s3443_s21), 0  ;;  %180 = sbr.rel (%p177_p3) target bundleno = 616 (0x268), region = 36 }
   0xa   : > { %s2433_s28 = smov (!%p177_p3), 17   ;;  %s2434_s29 = smov (!%p177_p3), 16   ;;  %v274_v19 = vshrl.u32 (!%p177_p3), %v273_v17, 7  ;;  %v2136_v27 = vld [vmem:[%s3432_s3 + $0x2] sm:$0x3] (!%p177_p3)  ;;  %vm262_vm2 = vcmask (!%p177_p3), 138240  }
   0xb   : > { %s2435_s30 = smov (!%p177_p3), 15   ;;  %s2436_s5 = smov (!%p177_p3), 1   ;;  %v2155_v30 = vld [vmem:[%s3432_s3 + $0x2] sm:$0x3] (!%p177_p3)  ;;  %v737_v37 = vld [vmem:[%s3432_s3] sm:$0x3] (!%p177_p3) }
   0xc   : > { %s2437_s6 = smov (!%p177_p3), 127   ;;  %s2438_s7 = smov (!%p177_p3), 113   ;;  %v2674_v23 = vsub.s32 (!%p177_p3), 0, %v274_v19  ;;  %v2688_v29 = vsub.s32 (!%p177_p3), 1, %v274_v19  ;;  %vm333_vm3 = vcmask (!%p177_p3), 121856   ;;  %vm369_vm4 = vcmask (!%p177_p3), 7168  }
   0xd   : > { %s2439_s8 = smov (!%p177_p3), 112   ;;  %s2440_s9 = smov (!%p177_p3), 111   ;;  %vm403_vm5 = vcmask (!%p177_p3), 1039360   ;;  %vm439_vm6 = vcmask (!%p177_p3), 924672   ;;  %vm475_vm7 = vcmask (!%p177_p3), 916480   ;;  %vm511_vm8 = vcmask (!%p177_p3), 908288  }
   0xe   : > { %v276_v33 = vrot.slane (!%p177_p3), %v271_v25, %v2674_v23  ;;  %v2703_v35 = vrot.slane (!%p177_p3), %v2136_v27, %v2674_v23  ;;  %v2706_v36 = vrot.slane (!%p177_p3), %v2136_v27, %v2688_v29  ;;  %v2712_v38 = vrot.slane (!%p177_p3), %v2155_v30, %v2674_v23  ;;  %s2124_s13 = sshll.u32 (!%p177_p3), %s2415_s15, 3 }
   0xf   : > { %v2715_v39 = vrot.slane (!%p177_p3), %v2155_v30, %v2688_v29  ;;  %v280_v47 = vrot.slane (!%p177_p3), %v271_v25, %v2688_v29  ;;  %v742_v52 = vrot.slane (!%p177_p3), %v737_v37, %v2674_v23  ;;  %v746_v56 = vrot.slane (!%p177_p3), %v737_v37, %v2688_v29  ;;  %p214_p6 = scmp.lt.s32.totalorder (!%p177_p3), %s2124_s13, 15 }
  0x10   : > { %s3447_s16 = smov (!%p206_p5, %s2419_s16), 1  ;;  %vm2442_vm9 = vmmov 1   ;;  %vm608_vm11 = vcmask 883712  }
  0x11   : > { %s2326_s22 = smul.u32 96, %s3447_s16  ;;  %vm3101_vm10 = vmpackc.low %vm247_vm0, %vm2442_vm9  ;;  %s3449_s13 = smov (!%p214_p6, %s2124_s13), 15 }
  0x12   : > { %s2125_s14 = sshll.u32 %s3447_s16, 4 }
  0x13   : > { %s210_s26 = scalar_lea.vmem %s3429_s0, %s2326_s22  ;;  %s217_s22 = sadd.s32 %s2125_s14, %s3449_s13 }
  0x14   : > { %s2508_s27 = scalar_lea.vmem %s210_s26, %s2198_s23 }
  0x15   : > { %v2511_v0 = vld [vmem:[%s2508_s27 + $0x20] sm:$0xff]  ;;  %v2514_v1 = vld [vmem:[%s2508_s27 + $0x28] sm:$0xff]  ;;  %v2531_v7 = vld [vmem:[%s2508_s27 + $0x18] sm:$0xff] }
  0x16   : > { %v2148_v2 = vld [vmem:[%s2508_s27 + $0x8] sm:$0xff]  ;;  %260 = vrot.lane.b32.xlu1 %v2511_v0, %s2433_s28  ;;  %v2521_v3 = vcombine.high %v2511_v0, %v2511_v0  ;;  %v227_v4 = vld [vmem:[%s2508_s27] sm:$0xff]  ;;  %v2528_v6 = vcombine.high %v2514_v1, %v2514_v1  ;;  %v2536_v9 = vld [vmem:[%s2508_s27 + $0x10] sm:$0xff]  ;;  %v710_v10 = vcombine.low %v2531_v7, %v2531_v7  ;;  %v1145_v22 = vcombine.low %v2511_v0, %v2511_v0 }
  0x17   : > { %v707_v5 = vcombine.high %v2148_v2, %v2148_v2  ;;  %v239_v8 = vcombine.high %v227_v4, %v227_v4  ;;  %v242_v12 = vcombine.low %v2536_v9, %v2536_v9  ;;  %v1142_v26 = vcombine.high %v2536_v9, %v2536_v9  ;;  %v2732_v46 = vld [vmem:[%s2508_s27 + $0x30] sm:$0xff] }
  0x18   : > { %253 = vrot.lane.b32.xlu0 %v2521_v3, %s2433_s28  ;;  %v2555_v14 = vsel %vm247_vm0, %v2148_v2, %v710_v10  ;;  %v1580_v31 = vcombine.low %v2514_v1, %v2514_v1  ;;  %v2697_v32 = vsel %vm247_vm0, %v2536_v9, %v1145_v22  ;;  %v1577_v41 = vcombine.high %v2531_v7, %v2531_v7 }
  0x19   : > { %v2542_v11 = vsel %vm247_vm0, %v707_v5, %v2531_v7  ;;  %v2550_v13 = vsel %vm247_vm0, %v239_v8, %v2536_v9  ;;  %v2560_v15 = vsel %vm247_vm0, %v227_v4, %v242_v12  ;;  %v2719_v40 = vsel %vm247_vm0, %v1142_v26, %v2511_v0 }
  0x1a   : > { %727 = vrot.lane.b32.xlu1 %v2514_v1, %s2433_s28  ;;  %v2729_v45 = vsel %vm247_vm0, %v2531_v7, %v1580_v31  ;;  %v2757_v59 = vsel %vm247_vm0, %v1577_v41, %v2514_v1  ;;  %v2761_v60 = vcombine.high %v2732_v46, %v2732_v46 }
  0x1c   : > { %720 = vrot.lane.b32.xlu0 %v2528_v6, %s2433_s28 }
  0x1e   : > { %753 = vrot.lane.b32.xlu1 %v2542_v11, %s2434_s29 }
  0x20   : > { %287 = vrot.lane.b32.xlu0 %v2550_v13, %s2434_s29 }
  0x22   : > { %759 = vrot.lane.b32.xlu1 %v2555_v14, %s2434_s29 }
  0x24   : > { %293 = vrot.lane.b32.xlu0 %v2560_v15, %s2434_s29 }
  0x26   : > { %258 = vrot.lane.b32.xlu1 %v2560_v15, %s2433_s28 }
  0x28   : > { %251 = vrot.lane.b32.xlu0 %v2550_v13, %s2433_s28 }
  0x2a   : > { %725 = vrot.lane.b32.xlu1 %v2555_v14, %s2433_s28 }
  0x2c   : > { %718 = vrot.lane.b32.xlu0 %v2542_v11, %s2433_s28 }
  0x2e   : > { %295 = vrot.lane.b32.xlu1 %v2511_v0, %s2434_s29 }
  0x30   : > { %289 = vrot.lane.b32.xlu0 %v2521_v3, %s2434_s29 }
  0x32   : > { %761 = vrot.lane.b32.xlu1 %v2514_v1, %s2434_s29 }
  0x34   : > { %755 = vrot.lane.b32.xlu0 %v2528_v6, %s2434_s29 }
  0x36   : > { %329 = vrot.lane.b32.xlu1 %v2560_v15, %s2435_s30 }
  0x38   : > { %323 = vrot.lane.b32.xlu0 %v2550_v13, %s2435_s30 }
  0x3a   : > { %793 = vrot.lane.b32.xlu1 %v2555_v14, %s2435_s30 }
  0x3c   : > { %787 = vrot.lane.b32.xlu0 %v2542_v11, %s2435_s30 }
  0x3e   : > { %361 = vrot.lane.b32.xlu1 %v2521_v3, %s2436_s5 }
  0x40   : > { %359 = vrot.lane.b32.xlu0 %v2550_v13, %s2436_s5 }
  0x42   : > { %367 = vrot.lane.b32.xlu1 %v2511_v0, %s2436_s5 }
  0x44   : > { %365 = vrot.lane.b32.xlu0 %v2560_v15, %s2436_s5 }
  0x46   : > { %823 = vrot.lane.b32.xlu1 %v2528_v6, %s2436_s5 }
  0x48   : > { %821 = vrot.lane.b32.xlu0 %v2542_v11, %s2436_s5 }
  0x4a   : > { %829 = vrot.lane.b32.xlu1 %v2514_v1, %s2436_s5 }
  0x4c   : > { %827 = vrot.lane.b32.xlu0 %v2555_v14, %s2436_s5 }
  0x4e   : > { %331 = vrot.lane.b32.xlu1 %v2511_v0, %s2435_s30 }
  0x50   : > { %325 = vrot.lane.b32.xlu0 %v2521_v3, %s2435_s30 }
  0x52   : > { %795 = vrot.lane.b32.xlu1 %v2514_v1, %s2435_s30 }
  0x54   : > { %789 = vrot.lane.b32.xlu0 %v2528_v6, %s2435_s30 }
  0x56   : > { %397 = vrot.lane.b32.xlu1 %v2550_v13, %s2437_s6 }
  0x58   : > { %395 = vrot.lane.b32.xlu0 %v2560_v15, %s2437_s6 }
  0x5a   : > { %857 = vrot.lane.b32.xlu1 %v2542_v11, %s2437_s6 }
  0x5c   : > { %855 = vrot.lane.b32.xlu0 %v2555_v14, %s2437_s6 }
  0x5e   : > { %401 = vrot.lane.b32.xlu1 %v2521_v3, %s2437_s6 }
  0x60   : > { %399 = vrot.lane.b32.xlu0 %v2511_v0, %s2437_s6 }
  0x62   : > { %861 = vrot.lane.b32.xlu1 %v2528_v6, %s2437_s6 }
  0x64   : > { %859 = vrot.lane.b32.xlu0 %v2514_v1, %s2437_s6 }
  0x66   : > { %433 = vrot.lane.b32.xlu1 %v2550_v13, %s2438_s7 }
  0x68   : > { %431 = vrot.lane.b32.xlu0 %v2560_v15, %s2438_s7 }
  0x6a   : > { %891 = vrot.lane.b32.xlu1 %v2542_v11, %s2438_s7 }
  0x6c   : > { %889 = vrot.lane.b32.xlu0 %v2555_v14, %s2438_s7 }
  0x6e   : > { %469 = vrot.lane.b32.xlu1 %v2550_v13, %s2439_s8 }
  0x70   : > { %467 = vrot.lane.b32.xlu0 %v2560_v15, %s2439_s8 }
  0x72   : > { %473 = vrot.lane.b32.xlu1 %v2521_v3, %s2439_s8 }
  0x74   : > { %471 = vrot.lane.b32.xlu0 %v2511_v0, %s2439_s8 }
  0x76   : > { %925 = vrot.lane.b32.xlu1 %v2542_v11, %s2439_s8 }
  0x78   : > { %923 = vrot.lane.b32.xlu0 %v2555_v14, %s2439_s8 }
  0x7a   : > { %929 = vrot.lane.b32.xlu1 %v2528_v6, %s2439_s8 }
  0x7c   : > { %927 = vrot.lane.b32.xlu0 %v2514_v1, %s2439_s8 }
  0x7e   : > { %437 = vrot.lane.b32.xlu1 %v2521_v3, %s2438_s7 }
  0x80   : > { %435 = vrot.lane.b32.xlu0 %v2511_v0, %s2438_s7 }
  0x82   : > { %895 = vrot.lane.b32.xlu1 %v2528_v6, %s2438_s7 }
  0x84   : > { %893 = vrot.lane.b32.xlu0 %v2514_v1, %s2438_s7 }
  0x86   : > { %505 = vrot.lane.b32.xlu1 %v2550_v13, %s2440_s9 }
  0x88   : > { %v261_v16 = vpop.permute.xlu1 %260  ;;  %503 = vrot.lane.b32.xlu0 %v2560_v15, %s2440_s9 }
  0x8a   : > { %v254_v18 = vpop.permute.xlu0 %253  ;;  %509 = vrot.lane.b32.xlu1 %v2521_v3, %s2440_s9 }
  0x8b   : > { %v264_v48 = vsel %vm262_vm2, %v261_v16, %v254_v18  ;;  %v270_v49 = vsel %vm262_vm2, %v254_v18, %v261_v16 }
  0x8c   : > { %v728_v20 = vpop.permute.xlu1 %727  ;;  %507 = vrot.lane.b32.xlu0 %v2511_v0, %s2440_s9  ;;  %v285_v61 = vmul.f32 %v276_v33, %v270_v49  ;;  %v286_v4 = vmul.f32 %v280_v47, %v264_v48 }
  0x8e   : > { %v721_v21 = vpop.permute.xlu0 %720  ;;  %959 = vrot.lane.b32.xlu1 %v2542_v11, %s2440_s9 }
  0x8f   : > { %v730_v5 = vsel %vm262_vm2, %v728_v20, %v721_v21  ;;  %v736_v7 = vsel %vm262_vm2, %v721_v21, %v728_v20  ;;  %v2782_v21 = vld [vmem:[%s2508_s27 + $0x38] sm:$0xff] }
  0x90   : > { %v754_v24 = vpop.permute.xlu1 %753  ;;  %957 = vrot.lane.b32.xlu0 %v2555_v14, %s2440_s9  ;;  %v751_v26 = vmul.f32 %v742_v52, %v736_v7  ;;  %v752_v30 = vmul.f32 %v746_v56, %v730_v5 }
  0x92   : > { %963 = vrot.lane.b32.xlu1 %v2528_v6, %s2440_s9  ;;  %v288_v28 = vpop.permute.xlu0 %287 }
  0x94   : > { %v760_v34 = vpop.permute.xlu1 %759  ;;  %961 = vrot.lane.b32.xlu0 %v2514_v1, %s2440_s9 }
  0x95   : > { %v763_v42 = vsel %vm297_vm1, %v760_v34, %v754_v24  ;;  %v769_v43 = vsel %vm297_vm1, %v754_v24, %v760_v34 }
  0x96   : > { %1194 = vrot.lane.b32.xlu1 %v2697_v32, %s2434_s29  ;;  %v294_v44 = vpop.permute.xlu0 %293  ;;  %v2750_v57 = vmul.f32 %v2712_v38, %v769_v43  ;;  %v2753_v58 = vmul.f32 %v2715_v39, %v763_v42  ;;  %v2441_v43 = vmov 0.0  }
  0x97   : > { %v298_v50 = vsel %vm297_vm1, %v294_v44, %v288_v28  ;;  %v304_v51 = vsel %vm297_vm1, %v288_v28, %v294_v44  ;;  %682 = vmatprep.mubr.f32.mxu0 %v2441_v43  ;;  %1125 = vmatprep.mubr.f32.mxu1 %v2441_v43 }
  0x98   : > { %v2741_v53 = vmul.f32 %v2703_v35, %v304_v51  ;;  %v2744_v54 = vmul.f32 %v2706_v36, %v298_v50  ;;  %v259_v55 = vpop.permute.xlu1 %258  ;;  %1188 = vrot.lane.b32.xlu0 %v2719_v40, %s2434_s29  ;;  %v995_v19 = vrot.slane %v2750_v57, 4  ;;  %v996_v20 = vrot.slane %v2753_v58, 4  ;;  %v2138_v57 = vld [vmem:[%s3432_s3 + $0x6] sm:$0x3] }
  0x9a   : > { %v543_v62 = vrot.slane %v2741_v53, 4  ;;  %v544_v63 = vrot.slane %v2744_v54, 4  ;;  %1629 = vrot.lane.b32.xlu1 %v2729_v45, %s2434_s29  ;;  %v252_v2 = vpop.permute.xlu0 %251  ;;  %v1048_v41 = vsel %vm247_vm0, %v752_v30, %v996_v20  ;;  %v1047_v42 = vsel %vm247_vm0, %v751_v26, %v995_v19 }
  0x9b   : > { %v269_v8 = vsel %vm262_vm2, %v252_v2, %v259_v55  ;;  %v263_v9 = vsel %vm262_vm2, %v259_v55, %v252_v2 }
  0x9c   : > { %v726_v10 = vpop.permute.xlu1 %725  ;;  %1623 = vrot.lane.b32.xlu0 %v2757_v59, %s2434_s29  ;;  %v284_v12 = vmul.f32 %v280_v47, %v263_v9  ;;  %v596_v16 = vsel %vm247_vm0, %v286_v4, %v544_v63  ;;  %v283_v17 = vmul.f32 %v276_v33, %v269_v8  ;;  %v595_v18 = vsel %vm247_vm0, %v285_v61, %v543_v62 }
  0x9d   : > { %v2792_v33 = vcombine.high %v2782_v21, %v2782_v21 }
  0x9e   : > { %1162 = vrot.lane.b32.xlu1 %v2732_v46, %s2433_s28  ;;  %v719_v22 = vpop.permute.xlu0 %718  ;;  %v2206_v24 = vpack.c.bf16 %v596_v16, %v284_v12  ;;  %v2208_v25 = vpack.c.bf16 %v595_v18, %v283_v17  ;;  %v2156_v12 = vld [vmem:[%s3432_s3 + $0x4] sm:$0x3] }
  0x9f   : > { %v735_v27 = vsel %vm262_vm2, %v719_v22, %v726_v10  ;;  %v729_v28 = vsel %vm262_vm2, %v726_v10, %v719_v22 }
  0xa0   : > { %v296_v31 = vpop.permute.xlu1 %295  ;;  %1155 = vrot.lane.b32.xlu0 %v2761_v60, %s2433_s28  ;;  %2207 = vmatprep.subr.bf16.mxu0 %v2206_v24  ;;  %v750_v34 = vmul.f32 %v746_v56, %v729_v28  ;;  %v749_v37 = vmul.f32 %v742_v52, %v735_v27  ;;  %v2137_v56 = vld [vmem:[%s3432_s3 + $0x4] sm:$0x3] }
  0xa1   : > { %2209 = vmatpush1.bf16.msra.mxu0 %v2208_v25 }
  0xa2   : > { %1597 = vrot.lane.b32.xlu1 %v2782_v21, %s2433_s28  ;;  %v290_v44 = vpop.permute.xlu0 %289  ;;  %v2236_v47 = vpack.c.bf16 %v1048_v41, %v750_v34  ;;  %v2238_v48 = vpack.c.bf16 %v1047_v42, %v749_v37 }
  0xa3   : > { %v299_v49 = vsel %vm297_vm1, %v296_v31, %v290_v44  ;;  %v305_v50 = vsel %vm297_vm1, %v290_v44, %v296_v31 }
  0xa4   : > { %v762_v51 = vpop.permute.xlu1 %761  ;;  %1590 = vrot.lane.b32.xlu0 %v2792_v33, %s2433_s28  ;;  %2237 = vmatprep.subr.bf16.mxu1 %v2236_v47  ;;  %v321_v52 = vmul.f32 %v2703_v35, %v305_v50  ;;  %v322_v55 = vmul.f32 %v2706_v36, %v299_v49  ;;  %v2820_v35 = vrot.slane %v2137_v56, %v2674_v23 }
  0xa5   : > { %2239 = vmatpush1.bf16.msra.mxu1 %v2238_v48  ;;  %v2823_v36 = vrot.slane %v2137_v56, %v2688_v29  ;;  %v388_v56 = vrot.slane %v2138_v57, %v2688_v29 }
  0xa6   : > { %1160 = vrot.lane.b32.xlu1 %v2697_v32, %s2433_s28  ;;  %v756_v61 = vpop.permute.xlu0 %755  ;;  %v545_v7 = vrot.slane %v321_v52, 4  ;;  %v547_v8 = vrot.slane %v322_v55, 4 }
  0xa7   : > { %v764_v2 = vsel %vm297_vm1, %v762_v51, %v756_v61  ;;  %v770_v4 = vsel %vm297_vm1, %v756_v61, %v762_v51 }
  0xa8   : > { %v330_v5 = vpop.permute.xlu1 %329  ;;  %1153 = vrot.lane.b32.xlu0 %v2719_v40, %s2433_s28  ;;  %v785_v9 = vmul.f32 %v2712_v38, %v770_v4  ;;  %v786_v10 = vmul.f32 %v2715_v39, %v764_v2  ;;  %v2839_v38 = vrot.slane %v2156_v12, %v2674_v23  ;;  %v2842_v39 = vrot.slane %v2156_v12, %v2688_v29  ;;  %v2157_v2 = vld [vmem:[%s3432_s3 + $0x6] sm:$0x3] }
  0xa9   : > { %v548_v28 = vsel %vm247_vm0, %v544_v63, %v547_v8  ;;  %v546_v30 = vsel %vm247_vm0, %v543_v62, %v545_v7 }
  0xaa   : > { %1595 = vrot.lane.b32.xlu1 %v2729_v45, %s2433_s28  ;;  %v324_v16 = vpop.permute.xlu0 %323  ;;  %v997_v26 = vrot.slane %v785_v9, 4  ;;  %v999_v27 = vrot.slane %v786_v10, 4  ;;  %v848_v10 = vrot.slane %v2157_v2, %v2688_v29 }
  0xab   : > { %v334_v17 = vsel %vm333_vm3, %v330_v5, %v324_v16  ;;  %v340_v18 = vsel %vm333_vm3, %v324_v16, %v330_v5 }
  0xac   : > { %v355_v22 = vmul.f32 %v2820_v35, %v340_v18  ;;  %v356_v24 = vmul.f32 %v2823_v36, %v334_v17  ;;  %v794_v25 = vpop.permute.xlu1 %793  ;;  %1588 = vrot.lane.b32.xlu0 %v2757_v59, %s2433_s28  ;;  %v1000_v53 = vsel %vm247_vm0, %v996_v20, %v999_v27  ;;  %v998_v62 = vsel %vm247_vm0, %v995_v19, %v997_v26 }
  0xad   : > { %v384_v20 = vrot.slane %v2138_v57, %v2674_v23 }
  0xae   : > { %1196 = vrot.lane.b32.xlu1 %v2732_v46, %s2434_s29  ;;  %v788_v31 = vpop.permute.xlu0 %787  ;;  %v2210_v34 = vpack.c.bf16 %v356_v24, %v548_v28  ;;  %v2212_v37 = vpack.c.bf16 %v355_v22, %v546_v30  ;;  %v844_v24 = vrot.slane %v2157_v2, %v2674_v23 }
  0xaf   : > { %v797_v41 = vsel %vm333_vm3, %v794_v25, %v788_v31  ;;  %v803_v42 = vsel %vm333_vm3, %v788_v31, %v794_v25 }
  0xb0   : > { %v817_v44 = vmul.f32 %v2839_v38, %v803_v42  ;;  %v818_v54 = vmul.f32 %v2842_v39, %v797_v41  ;;  %v362_v47 = vpop.permute.xlu1 %361  ;;  %1190 = vrot.lane.b32.xlu0 %v2761_v60, %s2434_s29  ;;  %2211 = vmatprep.subr.bf16.mxu0 %v2210_v34  ;;  %v2139_v41 = vld [vmem:[%s3432_s3 + $0xa] sm:$0x3] }
  0xb1   : > { %2213 = vmatpush1.bf16.msra.mxu0 %v2212_v37  ;;  %v2912_v57 = vrot.slane %v2139_v41, %v2674_v23 }
  0xb2   : > { %1631 = vrot.lane.b32.xlu1 %v2782_v21, %s2434_s29  ;;  %v360_v63 = vpop.permute.xlu0 %359  ;;  %v2240_v48 = vpack.c.bf16 %v818_v54, %v1000_v53  ;;  %v2242_v49 = vpack.c.bf16 %v817_v44, %v998_v62 }
  0xb4   : > { %v368_v50 = vpop.permute.xlu1 %367  ;;  %1625 = vrot.lane.b32.xlu0 %v2792_v33, %s2434_s29  ;;  %2241 = vmatprep.subr.bf16.mxu1 %v2240_v48 }
  0xb5   : > { %2243 = vmatpush1.bf16.msra.mxu1 %v2242_v49  ;;  %v377_v61 = vsel %vm369_vm4, %v362_v47, %v368_v50  ;;  %v371_v4 = vsel %vm369_vm4, %v368_v50, %v362_v47 }
  0xb6   : > { %1228 = vrot.lane.b32.xlu1 %v2697_v32, %s2435_s30  ;;  %v366_v58 = vpop.permute.xlu0 %365  ;;  %v393_v9 = vmul.f32 %v384_v20, %v377_v61  ;;  %v394_v16 = vmul.f32 %v388_v56, %v371_v4 }
  0xb7   : > { %v370_v51 = vsel %vm369_vm4, %v366_v58, %v360_v63  ;;  %v376_v52 = vsel %vm369_vm4, %v360_v63, %v366_v58 }
  0xb8   : > { %v824_v19 = vpop.permute.xlu1 %823  ;;  %1222 = vrot.lane.b32.xlu0 %v2719_v40, %s2435_s30  ;;  %v391_v7 = vmul.f32 %v384_v20, %v376_v52  ;;  %v392_v8 = vmul.f32 %v388_v56, %v370_v51  ;;  %v559_v42 = vrot.slane %v393_v9, 4  ;;  %v561_v44 = vrot.slane %v394_v16, 4 }
  0xba   : > { %1663 = vrot.lane.b32.xlu1 %v2729_v45, %s2435_s30  ;;  %v822_v55 = vpop.permute.xlu0 %821  ;;  %v557_v26 = vrot.slane %v391_v7, 4  ;;  %v558_v27 = vrot.slane %v392_v8, 4  ;;  %v424_v8 = vrot.slane %v2139_v41, %v2688_v29 }
  0xbc   : > { %v830_v5 = vpop.permute.xlu1 %829  ;;  %1657 = vrot.lane.b32.xlu0 %v2757_v59, %s2435_s30  ;;  %v562_v50 = vsel %vm247_vm0, %v558_v27, %v561_v44  ;;  %v560_v58 = vsel %vm247_vm0, %v557_v26, %v559_v42 }
  0xbd   : > { %v832_v17 = vsel %vm369_vm4, %v830_v5, %v824_v19  ;;  %v838_v28 = vsel %vm369_vm4, %v824_v19, %v830_v5 }
  0xbe   : > { %1258 = vrot.lane.b32.xlu1 %v2761_v60, %s2436_s5  ;;  %v828_v12 = vpop.permute.xlu0 %827  ;;  %v854_v31 = vmul.f32 %v848_v10, %v832_v17  ;;  %v853_v53 = vmul.f32 %v844_v24, %v838_v28 }
  0xbf   : > { %v831_v18 = vsel %vm369_vm4, %v828_v12, %v822_v55  ;;  %v837_v22 = vsel %vm369_vm4, %v822_v55, %v828_v12 }
  0xc0   : > { %v332_v25 = vpop.permute.xlu1 %331  ;;  %1256 = vrot.lane.b32.xlu0 %v2719_v40, %s2436_s5  ;;  %v852_v30 = vmul.f32 %v848_v10, %v831_v18  ;;  %v851_v34 = vmul.f32 %v844_v24, %v837_v22  ;;  %v1013_v19 = vrot.slane %v854_v31, 4  ;;  %v1011_v2 = vrot.slane %v853_v53, 4  ;;  %v2158_v10 = vld [vmem:[%s3432_s3 + $0xa] sm:$0x3] }
  0xc1   : > { %v878_v28 = vrot.slane %v2158_v10, %v2674_v23 }
  0xc2   : > { %1264 = vrot.lane.b32.xlu1 %v2732_v46, %s2436_s5  ;;  %v326_v37 = vpop.permute.xlu0 %325  ;;  %v1010_v49 = vrot.slane %v852_v30, 4  ;;  %v1009_v20 = vrot.slane %v851_v34, 4  ;;  %v882_v30 = vrot.slane %v2158_v10, %v2688_v29 }
  0xc3   : > { %v335_v54 = vsel %vm333_vm3, %v332_v25, %v326_v37  ;;  %v341_v47 = vsel %vm333_vm3, %v326_v37, %v332_v25 }
  0xc4   : > { %v357_v62 = vmul.f32 %v2820_v35, %v341_v47  ;;  %v358_v63 = vmul.f32 %v2823_v36, %v335_v54  ;;  %v796_v48 = vpop.permute.xlu1 %795  ;;  %1262 = vrot.lane.b32.xlu0 %v2697_v32, %s2436_s5  ;;  %v1014_v9 = vsel %vm247_vm0, %v1010_v49, %v1013_v19  ;;  %v1012_v12 = vsel %vm247_vm0, %v1009_v20, %v1011_v2 }
  0xc6   : > { %1693 = vrot.lane.b32.xlu1 %v2792_v33, %s2436_s5  ;;  %v790_v35 = vpop.permute.xlu0 %789  ;;  %v598_v36 = vsel %vm247_vm0, %v358_v63, %v558_v27  ;;  %v597_v51 = vsel %vm247_vm0, %v357_v62, %v557_v26 }
  0xc7   : > { %v798_v52 = vsel %vm333_vm3, %v796_v48, %v790_v35  ;;  %v804_v55 = vsel %vm333_vm3, %v790_v35, %v796_v48  ;;  %v2214_v56 = vpack.c.bf16 %v562_v50, %v598_v36  ;;  %v2216_v61 = vpack.c.bf16 %v560_v58, %v597_v51  ;;  %v2140_v51 = vld [vmem:[%s3432_s3 + $0xc] sm:$0x3] }
  0xc8   : > { %v819_v4 = vmul.f32 %v2839_v38, %v804_v55  ;;  %v820_v5 = vmul.f32 %v2842_v39, %v798_v52  ;;  %v398_v7 = vpop.permute.xlu1 %397  ;;  %1691 = vrot.lane.b32.xlu0 %v2757_v59, %s2436_s5 }
  0xc9   : > { %2215 = vmatprep.subr.bf16.mxu0 %v2214_v56 }
  0xca   : > { %1699 = vrot.lane.b32.xlu1 %v2782_v21, %s2436_s5  ;;  %2217 = vmatpush1.bf16.msra.mxu0 %v2216_v61  ;;  %v396_v38 = vpop.permute.xlu0 %395  ;;  %v1050_v39 = vsel %vm247_vm0, %v820_v5, %v1010_v49  ;;  %v1049_v16 = vsel %vm247_vm0, %v819_v4, %v1009_v20  ;;  %v2159_v5 = vld [vmem:[%s3432_s3 + $0xc] sm:$0x3] }
  0xcb   : > { %v404_v17 = vsel %vm403_vm5, %v396_v38, %v398_v7  ;;  %v412_v18 = vsel %vm403_vm5, %v398_v7, %v396_v38  ;;  %v2244_v22 = vpack.c.bf16 %v1014_v9, %v1050_v39  ;;  %v2246_v24 = vpack.c.bf16 %v1012_v12, %v1049_v16 }
  0xcc   : > { %v2937_v25 = vmul.f32 %v2912_v57, %v404_v17  ;;  %v2939_v26 = vmul.f32 %v424_v8, %v412_v18  ;;  %v858_v27 = vpop.permute.xlu1 %857  ;;  %1697 = vrot.lane.b32.xlu0 %v2729_v45, %s2436_s5  ;;  %v3005_v12 = vrot.slane %v2159_v5, %v2674_v23  ;;  %v3008_v16 = vrot.slane %v2159_v5, %v2688_v29 }
  0xcd   : > { %2245 = vmatprep.subr.bf16.mxu1 %v2244_v22 }
  0xce   : > { %v571_v31 = vrot.slane %v2937_v25, 4  ;;  %v572_v34 = vrot.slane %v2939_v26, 4  ;;  %2247 = vmatpush1.bf16.msra.mxu1 %v2246_v24  ;;  %v856_v37 = vpop.permute.xlu0 %855  ;;  %1230 = vrot.lane.b32.xlu1 %v2732_v46, %s2435_s30 }
  0xcf   : > { %v863_v41 = vsel %vm403_vm5, %v856_v37, %v858_v27  ;;  %v871_v42 = vsel %vm403_vm5, %v858_v27, %v856_v37 }
  0xd0   : > { %v2951_v44 = vmul.f32 %v878_v28, %v863_v41  ;;  %v2953_v54 = vmul.f32 %v882_v30, %v871_v42  ;;  %v402_v47 = vpop.permute.xlu1 %401  ;;  %1224 = vrot.lane.b32.xlu0 %v2761_v60, %s2435_s30  ;;  %v600_v53 = vsel %vm247_vm0, %v2521_v3, %v572_v34  ;;  %v599_v62 = vsel %vm247_vm0, %v2511_v0, %v571_v31 }
  0xd1   : > { %v2218_v63 = vpack.c.bf16 %v600_v53, %v2550_v13  ;;  %v2220_v48 = vpack.c.bf16 %v599_v62, %v2560_v15 }
  0xd2   : > { %v1023_v49 = vrot.slane %v2951_v44, 4  ;;  %v1024_v50 = vrot.slane %v2953_v54, 4  ;;  %v400_v58 = vpop.permute.xlu0 %399  ;;  %1665 = vrot.lane.b32.xlu1 %v2782_v21, %s2435_s30 }
  0xd3   : > { %v405_v19 = vsel %vm403_vm5, %v400_v58, %v402_v47  ;;  %v413_v20 = vsel %vm403_vm5, %v402_v47, %v400_v58  ;;  %2219 = vmatprep.subr.bf16.mxu0 %v2218_v63  ;;  %v2141_v63 = vld [vmem:[%s3432_s3 + $0xe] sm:$0x3] }
  0xd4   : > { %v862_v3 = vpop.permute.xlu1 %861  ;;  %1659 = vrot.lane.b32.xlu0 %v2792_v33, %s2435_s30  ;;  %2221 = vmatpush1.bf16.msra.mxu0 %v2220_v48  ;;  %v1052_v0 = vsel %vm247_vm0, %v2528_v6, %v1024_v50  ;;  %v429_v13 = vmul.f32 %v2912_v57, %v405_v19  ;;  %v430_v15 = vmul.f32 %v424_v8, %v413_v20 }
  0xd5   : > { %v2248_v35 = vpack.c.bf16 %v1052_v0, %v2542_v11  ;;  %v1051_v36 = vsel %vm247_vm0, %v2514_v1, %v1023_v49  ;;  %v2988_v1 = vrot.slane %v2140_v51, %v2674_v23  ;;  %v2991_v11 = vrot.slane %v2140_v51, %v2688_v29  ;;  %v2160_v0 = vld [vmem:[%s3432_s3 + $0xe] sm:$0x3] }
  0xd6   : > { %v860_v52 = vpop.permute.xlu0 %859  ;;  %1292 = vrot.lane.b32.xlu1 %v2719_v40, %s2437_s6  ;;  %v2250_v55 = vpack.c.bf16 %v1051_v36, %v2555_v14  ;;  %v573_v61 = vrot.slane %v429_v13, 4  ;;  %v575_v2 = vrot.slane %v430_v15, 4  ;;  %v496_v20 = vrot.slane %v2141_v63, %v2688_v29 }
  0xd7   : > { %v864_v6 = vsel %vm403_vm5, %v860_v52, %v862_v3  ;;  %v872_v57 = vsel %vm403_vm5, %v862_v3, %v860_v52  ;;  %2249 = vmatprep.subr.bf16.mxu1 %v2248_v35  ;;  %v950_v52 = vrot.slane %v2160_v0, %v2688_v29 }
  0xd8   : > { %v434_v56 = vpop.permute.xlu1 %433  ;;  %1290 = vrot.lane.b32.xlu0 %v2697_v32, %s2437_s6  ;;  %2251 = vmatpush1.bf16.msra.mxu1 %v2250_v55  ;;  %v887_v14 = vmul.f32 %v878_v28, %v864_v6  ;;  %v888_v4 = vmul.f32 %v882_v30, %v872_v57  ;;  %v576_v22 = vsel %vm247_vm0, %v572_v34, %v575_v2 }
  0xd9   : > { %v574_v24 = vsel %vm247_vm0, %v571_v31, %v573_v61  ;;  %v946_v2 = vrot.slane %v2160_v0, %v2674_v23 }
  0xda   : > { %v432_v7 = vpop.permute.xlu0 %431  ;;  %1727 = vrot.lane.b32.xlu1 %v2757_v59, %s2437_s6  ;;  %v1025_v17 = vrot.slane %v887_v14, 4  ;;  %v1027_v18 = vrot.slane %v888_v4, 4 }
  0xdb   : > { %v440_v8 = vsel %vm439_vm6, %v432_v7, %v434_v56  ;;  %v448_v9 = vsel %vm439_vm6, %v434_v56, %v432_v7 }
  0xdc   : > { %v463_v10 = vmul.f32 %v2988_v1, %v440_v8  ;;  %v464_v38 = vmul.f32 %v2991_v11, %v448_v9  ;;  %v892_v39 = vpop.permute.xlu1 %891  ;;  %1725 = vrot.lane.b32.xlu0 %v2729_v45, %s2437_s6  ;;  %v1028_v31 = vsel %vm247_vm0, %v1024_v50, %v1027_v18  ;;  %v1026_v34 = vsel %vm247_vm0, %v1023_v49, %v1025_v17 }
  0xdd   : > { %v492_v49 = vrot.slane %v2141_v63, %v2674_v23 }
  0xde   : > { %v890_v25 = vpop.permute.xlu0 %889  ;;  %1296 = vrot.lane.b32.xlu1 %v2761_v60, %s2437_s6  ;;  %v2222_v26 = vpack.c.bf16 %v464_v38, %v576_v22  ;;  %v2224_v27 = vpack.c.bf16 %v463_v10, %v574_v24 }
  0xdf   : > { %v897_v28 = vsel %vm439_vm6, %v890_v25, %v892_v39  ;;  %v905_v30 = vsel %vm439_vm6, %v892_v39, %v890_v25 }
  0xe0   : > { %v919_v37 = vmul.f32 %v3005_v12, %v897_v28  ;;  %v920_v41 = vmul.f32 %v3008_v16, %v905_v30  ;;  %v470_v42 = vpop.permute.xlu1 %469  ;;  %1294 = vrot.lane.b32.xlu0 %v2732_v46, %s2437_s6  ;;  %2223 = vmatprep.subr.bf16.mxu0 %v2222_v26 }
  0xe1   : > { %2225 = vmatpush1.bf16.msra.mxu0 %v2224_v27 }
  0xe2   : > { %v468_v44 = vpop.permute.xlu0 %467  ;;  %1731 = vrot.lane.b32.xlu1 %v2792_v33, %s2437_s6  ;;  %v2252_v54 = vpack.c.bf16 %v920_v41, %v1028_v31  ;;  %v2254_v47 = vpack.c.bf16 %v919_v37, %v1026_v34 }
  0xe3   : > { %v476_v3 = vsel %vm475_vm7, %v468_v44, %v470_v42  ;;  %v484_v13 = vsel %vm475_vm7, %v470_v42, %v468_v44 }
  0xe4   : > { %v474_v53 = vpop.permute.xlu1 %473  ;;  %1729 = vrot.lane.b32.xlu0 %v2782_v21, %s2437_s6  ;;  %2253 = vmatprep.subr.bf16.mxu1 %v2252_v54  ;;  %v499_v51 = vmul.f32 %v492_v49, %v476_v3  ;;  %v500_v6 = vmul.f32 %v496_v20, %v484_v13 }
  0xe5   : > { %2255 = vmatpush1.bf16.msra.mxu1 %v2254_v47 }
  0xe6   : > { %v472_v62 = vpop.permute.xlu0 %471  ;;  %1326 = vrot.lane.b32.xlu1 %v2719_v40, %s2438_s7  ;;  %v585_v39 = vrot.slane %v499_v51, 4  ;;  %v586_v17 = vrot.slane %v500_v6, 4 }
  0xe7   : > { %v477_v50 = vsel %vm475_vm7, %v472_v62, %v474_v53  ;;  %v485_v58 = vsel %vm475_vm7, %v474_v53, %v472_v62 }
  0xe8   : > { %v926_v48 = vpop.permute.xlu1 %925  ;;  %1324 = vrot.lane.b32.xlu0 %v2697_v32, %s2438_s7  ;;  %v501_v35 = vmul.f32 %v492_v49, %v477_v50  ;;  %v502_v36 = vmul.f32 %v496_v20, %v485_v58  ;;  %v2142_v49 = vld [vmem:[%s3432_s3 + $0x10] sm:$0x3] }
  0xe9   : > { %v528_v0 = vrot.slane %v2142_v49, %v2674_v23  ;;  %v532_v13 = vrot.slane %v2142_v49, %v2688_v29 }
  0xea   : > { %v924_v19 = vpop.permute.xlu0 %923  ;;  %1761 = vrot.lane.b32.xlu1 %v2757_v59, %s2438_s7  ;;  %v587_v4 = vrot.slane %v501_v35, 4  ;;  %v589_v5 = vrot.slane %v502_v36, 4 }
  0xeb   : > { %v939_v57 = vsel %vm475_vm7, %v926_v48, %v924_v19  ;;  %v931_v7 = vsel %vm475_vm7, %v924_v19, %v926_v48 }
  0xec   : > { %v930_v15 = vpop.permute.xlu1 %929  ;;  %1759 = vrot.lane.b32.xlu0 %v2729_v45, %s2438_s7  ;;  %v954_v9 = vmul.f32 %v950_v52, %v939_v57  ;;  %v953_v24 = vmul.f32 %v946_v2, %v931_v7  ;;  %v590_v30 = vsel %vm247_vm0, %v586_v17, %v589_v5  ;;  %v588_v37 = vsel %vm247_vm0, %v585_v39, %v587_v4 }
  0xee   : > { %v928_v55 = vpop.permute.xlu0 %927  ;;  %1360 = vrot.lane.b32.xlu1 %v2719_v40, %s2439_s8  ;;  %v1038_v41 = vrot.slane %v954_v9, 4  ;;  %v1037_v53 = vrot.slane %v953_v24, 4 }
  0xef   : > { %v932_v56 = vsel %vm475_vm7, %v928_v55, %v930_v15  ;;  %v940_v61 = vsel %vm475_vm7, %v930_v15, %v928_v55 }
  0xf0   : > { %v438_v14 = vpop.permute.xlu1 %437  ;;  %1358 = vrot.lane.b32.xlu0 %v2697_v32, %s2439_s8  ;;  %v956_v8 = vmul.f32 %v950_v52, %v940_v61  ;;  %v955_v10 = vmul.f32 %v946_v2, %v932_v56 }
  0xf2   : > { %v436_v38 = vpop.permute.xlu0 %435  ;;  %1364 = vrot.lane.b32.xlu1 %v2761_v60, %s2439_s8  ;;  %v1041_v28 = vrot.slane %v956_v8, 4  ;;  %v1039_v42 = vrot.slane %v955_v10, 4 }
  0xf3   : > { %v441_v18 = vsel %vm439_vm6, %v436_v38, %v438_v14  ;;  %v449_v22 = vsel %vm439_vm6, %v438_v14, %v436_v38  ;;  %v2161_v14 = vld [vmem:[%s3432_s3 + $0x10] sm:$0x3] }
  0xf4   : > { %v465_v25 = vmul.f32 %v2988_v1, %v441_v18  ;;  %v466_v26 = vmul.f32 %v2991_v11, %v449_v22  ;;  %v896_v27 = vpop.permute.xlu1 %895  ;;  %1362 = vrot.lane.b32.xlu0 %v2732_v46, %s2439_s8  ;;  %v1042_v50 = vsel %vm247_vm0, %v1038_v41, %v1041_v28  ;;  %v980_v9 = vrot.slane %v2161_v14, %v2674_v23  ;;  %v3120_v18 = vld [vmem:[%s3430_s1] sm:$0xff] }
  0xf5   : > { %v984_v10 = vrot.slane %v2161_v14, %v2688_v29 }
  0xf6   : > { %v894_v31 = vpop.permute.xlu0 %893  ;;  %1795 = vrot.lane.b32.xlu1 %v2757_v59, %s2439_s8  ;;  %v602_v34 = vsel %vm247_vm0, %v466_v26, %v586_v17  ;;  %v601_v1 = vsel %vm247_vm0, %v465_v25, %v585_v39 }
  0xf7   : > { %v898_v11 = vsel %vm439_vm6, %v894_v31, %v896_v27  ;;  %v906_v44 = vsel %vm439_vm6, %v896_v27, %v894_v31  ;;  %v2226_v54 = vpack.c.bf16 %v590_v30, %v602_v34  ;;  %v2228_v47 = vpack.c.bf16 %v588_v37, %v601_v1 }
  0xf8   : > { %v921_v62 = vmul.f32 %v3005_v12, %v898_v11  ;;  %v922_v63 = vmul.f32 %v3008_v16, %v906_v44  ;;  %v506_v48 = vpop.permute.xlu1 %505  ;;  %1793 = vrot.lane.b32.xlu0 %v2729_v45, %s2439_s8  ;;  %v1040_v16 = vsel %vm247_vm0, %v1037_v53, %v1039_v42  ;;  %v2170_v11 = vld [vmem:[%s3432_s3 + $0x2] sm:$0x3] }
  0xf9   : > { %2227 = vmatprep.subr.bf16.mxu0 %v2226_v54  ;;  %v3150_v54 = vrot.slane %v2170_v11, %v2674_v23 }
  0xfa   : > { %2229 = vmatpush1.bf16.msra.mxu0 %v2228_v47  ;;  %v504_v58 = vpop.permute.xlu0 %503  ;;  %1799 = vrot.lane.b32.xlu1 %v2792_v33, %s2439_s8  ;;  %v1054_v12 = vsel %vm247_vm0, %v922_v63, %v1038_v41  ;;  %v1053_v19 = vsel %vm247_vm0, %v921_v62, %v1037_v53  ;;  %v3153_v47 = vrot.slane %v2170_v11, %v2688_v29  ;;  %v1172_v53 = vld [vmem:[%s3432_s3] sm:$0x3] }
  0xfb   : > { %v2256_v20 = vpack.c.bf16 %v1042_v50, %v1054_v12  ;;  %v2258_v3 = vpack.c.bf16 %v1040_v16, %v1053_v19  ;;  %v512_v35 = vsel %vm511_vm8, %v504_v58, %v506_v48  ;;  %v520_v36 = vsel %vm511_vm8, %v506_v48, %v504_v58  ;;  %v2185_v48 = vld [vmem:[%s3432_s3 + $0x2] sm:$0x3] }
  0xfc   : > { %v510_v15 = vpop.permute.xlu1 %509  ;;  %1797 = vrot.lane.b32.xlu0 %v2782_v21, %s2439_s8  ;;  %v535_v6 = vmul.f32 %v528_v0, %v512_v35  ;;  %v536_v57 = vmul.f32 %v532_v13, %v520_v36  ;;  %v1177_v50 = vrot.slane %v1172_v53, %v2674_v23  ;;  %v1181_v58 = vrot.slane %v1172_v53, %v2688_v29  ;;  %v223_v12 = vld [vmem:[%s3431_s2] sm:$0xff] }
  0xfd   : > { %2257 = vmatprep.subr.bf16.mxu1 %v2256_v20 }
  0xfe   : > { %2259 = vmatpush1.bf16.msra.mxu1 %v2258_v3  ;;  %v508_v51 = vpop.permute.xlu0 %507  ;;  %1330 = vrot.lane.b32.xlu1 %v2761_v60, %s2438_s7 }
  0xff   : > { %v513_v52 = vsel %vm511_vm8, %v508_v51, %v510_v15  ;;  %v521_v55 = vsel %vm511_vm8, %v510_v15, %v508_v51  ;;  %v1650_v15 = vrot.slane %v2185_v48, %v2688_v29 }
 0x100   : > { %v537_v56 = vmul.f32 %v528_v0, %v513_v52  ;;  %v538_v61 = vmul.f32 %v532_v13, %v521_v55  ;;  %v960_v2 = vpop.permute.xlu1 %959  ;;  %1328 = vrot.lane.b32.xlu0 %v2732_v46, %s2438_s7  ;;  %v1646_v13 = vrot.slane %v2185_v48, %v2674_v23 }
 0x102   : > { %v2230_v5 = vpack.c.bf16 %v538_v61, %v536_v57  ;;  %v2233_v7 = vpack.c.bf16 %v537_v56, %v535_v6  ;;  %v958_v8 = vpop.permute.xlu0 %957  ;;  %1765 = vrot.lane.b32.xlu1 %v2792_v33, %s2438_s7 }
 0x103   : > { %v965_v38 = vsel %vm511_vm8, %v958_v8, %v960_v2  ;;  %v973_v17 = vsel %vm511_vm8, %v960_v2, %v958_v8 }
 0x104   : > { %v964_v39 = vpop.permute.xlu1 %963  ;;  %1763 = vrot.lane.b32.xlu0 %v2782_v21, %s2438_s7  ;;  %2232 = vmatprep.subr.msk.bf16.mxu0 %vm3101_vm10, %v2230_v5  ;;  %v987_v24 = vmul.f32 %v980_v9, %v965_v38  ;;  %v988_v27 = vmul.f32 %v984_v10, %v973_v17  ;;  %s2126_s7 = sshll.u32 %s217_s22, 3 }
 0x105   : > { %2235 = vmatpush1.bf16.msk.msra.mxu0 %vm3101_vm10, %v2233_v7  ;;  %s219_s5 = scalar_lea.vmem %s3433_s4, %s2126_s7 }
 0x106   : > { %v962_v22 = vpop.permute.xlu0 %961  ;;  %1394 = vrot.lane.b32.xlu1 %v2719_v40, %s2440_s9 }
 0x107   : > { %v966_v25 = vsel %vm511_vm8, %v962_v22, %v964_v39  ;;  %v974_v26 = vsel %vm511_vm8, %v964_v39, %v962_v22 }
 0x108   : > { %v989_v28 = vmul.f32 %v980_v9, %v966_v25  ;;  %v990_v30 = vmul.f32 %v984_v10, %v974_v26  ;;  %v1195_v37 = vpop.permute.xlu1 %1194  ;;  %1392 = vrot.lane.b32.xlu0 %v2697_v32, %s2440_s9  ;;  %2145 = vmatmul.mubr.msk.f32.vlgmr.msra.gmra.mrb[0].mxu0 %vm608_vm11, %v3120_v18 }
 0x109   : > { %1560 = vmatprep.mubr.f32.mxu0 %v2441_v43 }
 0x10a   : > { %v2260_v41 = vpack.c.bf16 %v990_v30, %v988_v27  ;;  %v2263_v42 = vpack.c.bf16 %v989_v28, %v987_v24  ;;  %v1189_v31 = vpop.permute.xlu0 %1188  ;;  %1398 = vrot.lane.b32.xlu1 %v2761_v60, %s2440_s9 }
 0x10b   : > { %v1198_v63 = vsel %vm297_vm1, %v1195_v37, %v1189_v31 }
 0x10c   : > { %v1630_v34 = vpop.permute.xlu1 %1629  ;;  %1396 = vrot.lane.b32.xlu0 %v2732_v46, %s2440_s9  ;;  %2262 = vmatprep.subr.msk.bf16.mxu1 %vm3101_vm10, %v2260_v41  ;;  %v2443_v46 = vmov 0   ;;  %v3176_v19 = vmul.f32 %v3153_v47, %v1198_v63 }
 0x10d   : > { %2265 = vmatpush1.bf16.msk.msra.mxu1 %vm3101_vm10, %v2263_v42  ;;  %2378 = vset.pattern.permute.xlu0 %v2443_v46 }
 0x10e   : > { %v1624_v1 = vpop.permute.xlu0 %1623  ;;  %1829 = vrot.lane.b32.xlu1 %v2757_v59, %s2440_s9  ;;  %v1431_v61 = vrot.slane %v3176_v19, 4 }
 0x10f   : > { %v1633_v35 = vsel %vm297_vm1, %v1630_v34, %v1624_v1  ;;  %v1639_v36 = vsel %vm297_vm1, %v1624_v1, %v1630_v34 }
 0x110   : > { %v1163_v44 = vpop.permute.xlu1 %1162  ;;  %1827 = vrot.lane.b32.xlu0 %v2729_v45, %s2440_s9  ;;  %2164 = vmatmul.mubr.msk.f32.vlgmr.msra.gmra.mrb[0].mxu1 %vm608_vm11, %v3120_v18  ;;  %v3193_v7 = vmul.f32 %v1646_v13, %v1639_v36  ;;  %v3195_v8 = vmul.f32 %v1650_v15, %v1633_v35 }
 0x111   : > { %1995 = vmatprep.mubr.f32.mxu1 %v2441_v43  ;;  %v1204_v43 = vsel %vm297_vm1, %v1189_v31, %v1195_v37 }
 0x112   : > { %v1156_v62 = vpop.permute.xlu0 %1155  ;;  %1833 = vrot.lane.b32.xlu1 %v2792_v33, %s2440_s9  ;;  %v3173_v16 = vmul.f32 %v3150_v54, %v1204_v43  ;;  %v1865_v37 = vrot.slane %v3193_v7, 4  ;;  %v1866_v41 = vrot.slane %v3195_v8, 4 }
 0x113   : > { %v1165_v20 = vsel %vm262_vm2, %v1163_v44, %v1156_v62  ;;  %v1171_v3 = vsel %vm262_vm2, %v1156_v62, %v1163_v44 }
 0x114   : > { %v1598_v49 = vpop.permute.xlu1 %1597  ;;  %1831 = vrot.lane.b32.xlu0 %v2782_v21, %s2440_s9  ;;  %v1607_v21 = vld [vmem:[%s3432_s3] sm:$0x3]  ;;  %v1186_v52 = vmul.f32 %v1177_v50, %v1171_v3  ;;  %v1187_v55 = vmul.f32 %v1181_v58, %v1165_v20  ;;  %v1430_v56 = vrot.slane %v3173_v16, 4 }
 0x115   : > { %v1612_v6 = vrot.slane %v1607_v21, %v2674_v23  ;;  %v1616_v57 = vrot.slane %v1607_v21, %v2688_v29 }
 0x116   : > { %v1591_v0 = vpop.permute.xlu0 %1590  ;;  %v1482_v25 = vsel %vm247_vm0, %v1186_v52, %v1430_v56  ;;  %v1483_v26 = vsel %vm247_vm0, %v1187_v55, %v1431_v61  ;;  %v2186_v55 = vld [vmem:[%s3432_s3 + $0x4] sm:$0x3] }
 0x117   : > { %v1600_v2 = vsel %vm262_vm2, %v1598_v49, %v1591_v0  ;;  %v1606_v14 = vsel %vm262_vm2, %v1591_v0, %v1598_v49  ;;  %v3234_v8 = vrot.slane %v2186_v55, %v2674_v23 }
 0x118   : > { %v1161_v51 = vpop.permute.xlu1 %1160  ;;  %605 = vperm.xlu0 %2378, %v223_v12   ;;  %v1621_v22 = vmul.f32 %v1612_v6, %v1606_v14  ;;  %v1622_v24 = vmul.f32 %v1616_v57, %v1600_v2  ;;  %v2171_v12 = vld [vmem:[%s3432_s3 + $0x4] sm:$0x3] }
 0x119   : > { %v3221_v35 = vrot.slane %v2171_v12, %v2674_v23  ;;  %v3224_v36 = vrot.slane %v2171_v12, %v2688_v29 }
 0x11a   : > { %v1154_v5 = vpop.permute.xlu0 %1153  ;;  %v1917_v44 = vsel %vm247_vm0, %v1621_v22, %v1865_v37  ;;  %v1918_v46 = vsel %vm247_vm0, %v1622_v24, %v1866_v41 }
 0x11b   : > { %v1164_v9 = vsel %vm262_vm2, %v1161_v51, %v1154_v5  ;;  %v1170_v10 = vsel %vm262_vm2, %v1154_v5, %v1161_v51 }
 0x11c   : > { %v1184_v38 = vmul.f32 %v1177_v50, %v1170_v10  ;;  %v1185_v39 = vmul.f32 %v1181_v58, %v1164_v9  ;;  %v1596_v17 = vpop.permute.xlu1 %1595 }
 0x11e   : > { %v2268_v27 = vpack.c.bf16 %v1482_v25, %v1184_v38  ;;  %v1589_v28 = vpop.permute.xlu0 %1588  ;;  %v2266_v30 = vpack.c.bf16 %v1483_v26, %v1185_v39 }
 0x11f   : > { %v1599_v42 = vsel %vm262_vm2, %v1596_v17, %v1589_v28  ;;  %v1605_v31 = vsel %vm262_vm2, %v1589_v28, %v1596_v17 }
 0x120   : > { %v1619_v34 = vmul.f32 %v1612_v6, %v1605_v31  ;;  %v1620_v1 = vmul.f32 %v1616_v57, %v1599_v42  ;;  %v1197_v11 = vpop.permute.xlu1 %1196  ;;  %2267 = vmatprep.subr.bf16.mxu0 %v2266_v30 }
 0x121   : > { %2269 = vmatpush1.bf16.msra.mxu0 %v2268_v27 }
 0x122   : > { %v2298_v53 = vpack.c.bf16 %v1917_v44, %v1619_v34  ;;  %v1191_v62 = vpop.permute.xlu0 %1190  ;;  %v2296_v63 = vpack.c.bf16 %v1918_v46, %v1620_v1  ;;  %v2172_v34 = vld [vmem:[%s3432_s3 + $0x6] sm:$0x3] }
 0x123   : > { %v1199_v43 = vsel %vm297_vm1, %v1197_v11, %v1191_v62  ;;  %v1205_v48 = vsel %vm297_vm1, %v1191_v62, %v1197_v11  ;;  %v1279_v46 = vrot.slane %v2172_v34, %v2674_v23 }
 0x124   : > { %v1632_v49 = vpop.permute.xlu1 %1631  ;;  %2297 = vmatprep.subr.bf16.mxu1 %v2296_v63  ;;  %v1220_v50 = vmul.f32 %v3150_v54, %v1205_v48  ;;  %v1221_v58 = vmul.f32 %v3153_v47, %v1199_v43 }
 0x125   : > { %2299 = vmatpush1.bf16.msra.mxu1 %v2298_v53 }
 0x126   : > { %v1626_v20 = vpop.permute.xlu0 %1625  ;;  %v1432_v54 = vrot.slane %v1220_v50, 4  ;;  %v1434_v51 = vrot.slane %v1221_v58, 4 }
 0x127   : > { %v1634_v3 = vsel %vm297_vm1, %v1632_v49, %v1626_v20  ;;  %v1640_v21 = vsel %vm297_vm1, %v1626_v20, %v1632_v49  ;;  %v2187_v49 = vld [vmem:[%s3432_s3 + $0x6] sm:$0x3] }
 0x128   : > { %v1229_v0 = vpop.permute.xlu1 %1228  ;;  %v1655_v47 = vmul.f32 %v1646_v13, %v1640_v21  ;;  %v1656_v52 = vmul.f32 %v1650_v15, %v1634_v3  ;;  %v3237_v13 = vrot.slane %v2186_v55, %v2688_v29  ;;  %v1433_v10 = vsel %vm247_vm0, %v1430_v56, %v1432_v54 }
 0x129   : > { %v1435_v38 = vsel %vm247_vm0, %v1431_v61, %v1434_v51  ;;  %v1714_v21 = vrot.slane %v2187_v49, %v2674_v23 }
 0x12a   : > { %v1223_v6 = vpop.permute.xlu0 %1222  ;;  %v1867_v15 = vrot.slane %v1655_v47, 4  ;;  %v1869_v9 = vrot.slane %v1656_v52, 4 }
 0x12b   : > { %v1232_v57 = vsel %vm333_vm3, %v1229_v0, %v1223_v6  ;;  %v1238_v2 = vsel %vm333_vm3, %v1223_v6, %v1229_v0  ;;  %v1718_v0 = vrot.slane %v2187_v49, %v2688_v29 }
 0x12c   : > { %v1252_v14 = vmul.f32 %v3221_v35, %v1238_v2  ;;  %v1253_v5 = vmul.f32 %v3224_v36, %v1232_v57  ;;  %v1664_v7 = vpop.permute.xlu1 %1663  ;;  %v1868_v16 = vsel %vm247_vm0, %v1865_v37, %v1867_v15  ;;  %v1870_v19 = vsel %vm247_vm0, %v1866_v41, %v1869_v9 }
 0x12d   : > { %v1283_v41 = vrot.slane %v2172_v34, %v2688_v29 }
 0x12e   : > { %v2272_v39 = vpack.c.bf16 %v1252_v14, %v1433_v10  ;;  %v1658_v17 = vpop.permute.xlu0 %1657  ;;  %v2270_v22 = vpack.c.bf16 %v1253_v5, %v1435_v38  ;;  %v2173_v14 = vld [vmem:[%s3432_s3 + $0xa] sm:$0x3] }
 0x12f   : > { %v1667_v24 = vsel %vm333_vm3, %v1664_v7, %v1658_v17  ;;  %v1673_v25 = vsel %vm333_vm3, %v1658_v17, %v1664_v7 }
 0x130   : > { %v1687_v26 = vmul.f32 %v3234_v8, %v1673_v25  ;;  %v1688_v27 = vmul.f32 %v3237_v13, %v1667_v24  ;;  %v1259_v28 = vpop.permute.xlu1 %1258  ;;  %2271 = vmatprep.subr.bf16.mxu0 %v2270_v22 }
 0x131   : > { %2273 = vmatpush1.bf16.msra.mxu0 %v2272_v39 }
 0x132   : > { %v2302_v56 = vpack.c.bf16 %v1687_v26, %v1868_v16  ;;  %v1257_v61 = vpop.permute.xlu0 %1256  ;;  %v2300_v30 = vpack.c.bf16 %v1688_v27, %v1870_v19  ;;  %v1313_v26 = vrot.slane %v2173_v14, %v2674_v23  ;;  %v1317_v27 = vrot.slane %v2173_v14, %v2688_v29 }
 0x134   : > { %v1265_v42 = vpop.permute.xlu1 %1264  ;;  %2301 = vmatprep.subr.bf16.mxu1 %v2300_v30 }
 0x135   : > { %2303 = vmatpush1.bf16.msra.mxu1 %v2302_v56  ;;  %v1267_v53 = vsel %vm369_vm4, %v1265_v42, %v1259_v28  ;;  %v1273_v62 = vsel %vm369_vm4, %v1259_v28, %v1265_v42 }
 0x136   : > { %v1263_v31 = vpop.permute.xlu0 %1262  ;;  %v1288_v58 = vmul.f32 %v1279_v46, %v1273_v62  ;;  %v1289_v12 = vmul.f32 %v1283_v41, %v1267_v53 }
 0x137   : > { %v1266_v11 = vsel %vm369_vm4, %v1263_v31, %v1257_v61  ;;  %v1272_v44 = vsel %vm369_vm4, %v1257_v61, %v1263_v31 }
 0x138   : > { %v1694_v1 = vpop.permute.xlu1 %1693  ;;  %v1286_v43 = vmul.f32 %v1279_v46, %v1272_v44  ;;  %v1287_v48 = vmul.f32 %v1283_v41, %v1266_v11  ;;  %v1446_v5 = vrot.slane %v1288_v58, 4  ;;  %v1448_v7 = vrot.slane %v1289_v12, 4 }
 0x13a   : > { %v1692_v37 = vpop.permute.xlu0 %1691  ;;  %v1444_v51 = vrot.slane %v1286_v43, 4  ;;  %v1445_v47 = vrot.slane %v1287_v48, 4 }
 0x13c   : > { %v1700_v63 = vpop.permute.xlu1 %1699  ;;  %v1447_v24 = vsel %vm247_vm0, %v1444_v51, %v1446_v5  ;;  %v1449_v25 = vsel %vm247_vm0, %v1445_v47, %v1448_v7 }
 0x13d   : > { %v1702_v52 = vsel %vm369_vm4, %v1700_v63, %v1694_v1  ;;  %v1708_v55 = vsel %vm369_vm4, %v1694_v1, %v1700_v63 }
 0x13e   : > { %v1698_v50 = vpop.permute.xlu0 %1697  ;;  %v1723_v10 = vmul.f32 %v1714_v21, %v1708_v55  ;;  %v1724_v38 = vmul.f32 %v1718_v0, %v1702_v52 }
 0x13f   : > { %v1701_v20 = vsel %vm369_vm4, %v1698_v50, %v1692_v37  ;;  %v1707_v3 = vsel %vm369_vm4, %v1692_v37, %v1698_v50  ;;  %v2188_v37 = vld [vmem:[%s3432_s3 + $0xa] sm:$0x3] }
 0x140   : > { %v1231_v54 = vpop.permute.xlu1 %1230  ;;  %v1721_v6 = vmul.f32 %v1714_v21, %v1707_v3  ;;  %v1722_v57 = vmul.f32 %v1718_v0, %v1701_v20  ;;  %v1881_v31 = vrot.slane %v1723_v10, 4  ;;  %v1883_v34 = vrot.slane %v1724_v38, 4 }
 0x141   : > { %v1748_v12 = vrot.slane %v2188_v37, %v2674_v23  ;;  %v1752_v20 = vrot.slane %v2188_v37, %v2688_v29 }
 0x142   : > { %v1225_v2 = vpop.permute.xlu0 %1224  ;;  %v1879_v28 = vrot.slane %v1721_v6, 4  ;;  %v1880_v16 = vrot.slane %v1722_v57, 4 }
 0x143   : > { %v1233_v15 = vsel %vm333_vm3, %v1231_v54, %v1225_v2  ;;  %v1239_v9 = vsel %vm333_vm3, %v1225_v2, %v1231_v54 }
 0x144   : > { %v1254_v39 = vmul.f32 %v3221_v35, %v1239_v9  ;;  %v1255_v17 = vmul.f32 %v3224_v36, %v1233_v15  ;;  %v1666_v22 = vpop.permute.xlu1 %1665  ;;  %v1882_v46 = vsel %vm247_vm0, %v1879_v28, %v1881_v31  ;;  %v1884_v62 = vsel %vm247_vm0, %v1880_v16, %v1883_v34 }
 0x146   : > { %v1484_v19 = vsel %vm247_vm0, %v1254_v39, %v1444_v51  ;;  %v1660_v56 = vpop.permute.xlu0 %1659  ;;  %v1485_v61 = vsel %vm247_vm0, %v1255_v17, %v1445_v47  ;;  %v2391_v47 = vld [vmem:[%s2508_s27 + $0x30] sm:$0xff]  ;;  %v2392_v39 = vld [vmem:[%s2508_s27 + $0x38] sm:$0xff] }
 0x147   : > { %v1668_v35 = vsel %vm333_vm3, %v1666_v22, %v1660_v56  ;;  %v1674_v36 = vsel %vm333_vm3, %v1660_v56, %v1666_v22  ;;  %v2274_v30 = vpack.c.bf16 %v1449_v25, %v1485_v61  ;;  %v2276_v42 = vpack.c.bf16 %v1447_v24, %v1484_v19 }
 0x148   : > { %v1689_v1 = vmul.f32 %v3234_v8, %v1674_v36  ;;  %v1690_v11 = vmul.f32 %v3237_v13, %v1668_v35  ;;  %v1293_v44 = vpop.permute.xlu1 %1292  ;;  %v2189_v36 = vld [vmem:[%s3432_s3 + $0xc] sm:$0x3] }
 0x149   : > { %2275 = vmatprep.subr.bf16.mxu0 %v2274_v30  ;;  %v3335_v37 = vrot.slane %v2189_v36, %v2688_v29 }
 0x14a   : > { %v1919_v41 = vsel %vm247_vm0, %v1689_v1, %v1879_v28  ;;  %2277 = vmatpush1.bf16.msra.mxu0 %v2276_v42  ;;  %v1291_v53 = vpop.permute.xlu0 %1290  ;;  %v1920_v63 = vsel %vm247_vm0, %v1690_v11, %v1880_v16  ;;  %v2174_v28 = vld [vmem:[%s3432_s3 + $0xc] sm:$0x3] }
 0x14b   : > { %v1298_v8 = vsel %vm403_vm5, %v1291_v53, %v1293_v44  ;;  %v1306_v13 = vsel %vm403_vm5, %v1293_v44, %v1291_v53  ;;  %v2304_v43 = vpack.c.bf16 %v1884_v62, %v1920_v63  ;;  %v2306_v48 = vpack.c.bf16 %v1882_v46, %v1919_v41 }
 0x14c   : > { %v1320_v49 = vmul.f32 %v1313_v26, %v1298_v8  ;;  %v1321_v50 = vmul.f32 %v1317_v27, %v1306_v13  ;;  %v1728_v58 = vpop.permute.xlu1 %1727  ;;  %v3332_v44 = vrot.slane %v2189_v36, %v2674_v23 }
 0x14d   : > { %2305 = vmatprep.subr.bf16.mxu1 %v2304_v43 }
 0x14e   : > { %v1458_v3 = vrot.slane %v1320_v49, 4  ;;  %v1459_v21 = vrot.slane %v1321_v50, 4  ;;  %2307 = vmatpush1.bf16.msra.mxu1 %v2306_v48  ;;  %v1726_v0 = vpop.permute.xlu0 %1725 }
 0x14f   : > { %v1733_v54 = vsel %vm403_vm5, %v1726_v0, %v1728_v58  ;;  %v1741_v51 = vsel %vm403_vm5, %v1728_v58, %v1726_v0 }
 0x150   : > { %v1486_v52 = vsel %vm247_vm0, %v2391_v47, %v1458_v3  ;;  %v1755_v55 = vmul.f32 %v1748_v12, %v1733_v54  ;;  %v1756_v6 = vmul.f32 %v1752_v20, %v1741_v51  ;;  %v1297_v57 = vpop.permute.xlu1 %1296  ;;  %v1487_v2 = vsel %vm247_vm0, %v2761_v60, %v1459_v21  ;;  %v2175_v47 = vld [vmem:[%s3432_s3 + $0xe] sm:$0x3] }
 0x151   : > { %v2278_v14 = vpack.c.bf16 %v1487_v2, %v2719_v40  ;;  %v2280_v5 = vpack.c.bf16 %v1486_v52, %v2697_v32  ;;  %v1381_v2 = vrot.slane %v2175_v47, %v2674_v23 }
 0x152   : > { %v1893_v7 = vrot.slane %v1755_v55, 4  ;;  %v1894_v15 = vrot.slane %v1756_v6, 4  ;;  %v1295_v9 = vpop.permute.xlu0 %1294 }
 0x153   : > { %v1299_v10 = vsel %vm403_vm5, %v1295_v9, %v1297_v57  ;;  %v1307_v38 = vsel %vm403_vm5, %v1297_v57, %v1295_v9  ;;  %2279 = vmatprep.subr.bf16.mxu0 %v2278_v14  ;;  %v1385_v14 = vrot.slane %v2175_v47, %v2688_v29 }
 0x154   : > { %v1921_v17 = vsel %vm247_vm0, %v2392_v39, %v1893_v7  ;;  %2281 = vmatpush1.bf16.msra.mxu0 %v2280_v5  ;;  %v1732_v22 = vpop.permute.xlu1 %1731  ;;  %v1922_v60 = vsel %vm247_vm0, %v2792_v33, %v1894_v15  ;;  %v1322_v24 = vmul.f32 %v1313_v26, %v1299_v10  ;;  %v1323_v40 = vmul.f32 %v1317_v27, %v1307_v38  ;;  %v2190_v38 = vld [vmem:[%s3432_s3 + $0xe] sm:$0x3] }
 0x155   : > { %v2308_v32 = vpack.c.bf16 %v1922_v60, %v2757_v59  ;;  %v2310_v25 = vpack.c.bf16 %v1921_v17, %v2729_v45  ;;  %v3319_v33 = vrot.slane %v2174_v28, %v2674_v23  ;;  %v3322_v26 = vrot.slane %v2174_v28, %v2688_v29 }
 0x156   : > { %v1730_v16 = vpop.permute.xlu0 %1729  ;;  %v1460_v59 = vrot.slane %v1322_v24, 4  ;;  %v1462_v45 = vrot.slane %v1323_v40, 4  ;;  %v1816_v40 = vrot.slane %v2190_v38, %v2674_v23 }
 0x157   : > { %v1734_v19 = vsel %vm403_vm5, %v1730_v16, %v1732_v22  ;;  %v1742_v56 = vsel %vm403_vm5, %v1732_v22, %v1730_v16  ;;  %2309 = vmatprep.subr.bf16.mxu1 %v2308_v32  ;;  %v1820_v32 = vrot.slane %v2190_v38, %v2688_v29 }
 0x158   : > { %2311 = vmatpush1.bf16.msra.mxu1 %v2310_v25  ;;  %v1327_v61 = vpop.permute.xlu1 %1326  ;;  %v1757_v27 = vmul.f32 %v1748_v12, %v1734_v19  ;;  %v1758_v35 = vmul.f32 %v1752_v20, %v1742_v56  ;;  %v1461_v53 = vsel %vm247_vm0, %v1458_v3, %v1460_v59  ;;  %v1463_v62 = vsel %vm247_vm0, %v1459_v21, %v1462_v45 }
 0x15a   : > { %v1325_v30 = vpop.permute.xlu0 %1324  ;;  %v1895_v46 = vrot.slane %v1757_v27, 4  ;;  %v1897_v41 = vrot.slane %v1758_v35, 4 }
 0x15b   : > { %v1332_v42 = vsel %vm439_vm6, %v1325_v30, %v1327_v61  ;;  %v1340_v31 = vsel %vm439_vm6, %v1327_v61, %v1325_v30 }
 0x15c   : > { %v1354_v34 = vmul.f32 %v3319_v33, %v1332_v42  ;;  %v1355_v1 = vmul.f32 %v3322_v26, %v1340_v31  ;;  %v1762_v11 = vpop.permute.xlu1 %1761  ;;  %v1896_v12 = vsel %vm247_vm0, %v1893_v7, %v1895_v46  ;;  %v1898_v20 = vsel %vm247_vm0, %v1894_v15, %v1897_v41 }
 0x15e   : > { %v2284_v63 = vpack.c.bf16 %v1354_v34, %v1461_v53  ;;  %v1760_v8 = vpop.permute.xlu0 %1759  ;;  %v2282_v13 = vpack.c.bf16 %v1355_v1, %v1463_v62 }
 0x15f   : > { %v1767_v43 = vsel %vm439_vm6, %v1760_v8, %v1762_v11  ;;  %v1775_v48 = vsel %vm439_vm6, %v1762_v11, %v1760_v8 }
 0x160   : > { %v1789_v49 = vmul.f32 %v3332_v44, %v1767_v43  ;;  %v1790_v50 = vmul.f32 %v3335_v37, %v1775_v48  ;;  %2283 = vmatprep.subr.bf16.mxu0 %v2282_v13  ;;  %v1361_v58 = vpop.permute.xlu1 %1360 }
 0x161   : > { %2285 = vmatpush1.bf16.msra.mxu0 %v2284_v63 }
 0x162   : > { %v2314_v3 = vpack.c.bf16 %v1789_v49, %v1896_v12  ;;  %v1359_v21 = vpop.permute.xlu0 %1358  ;;  %v2312_v0 = vpack.c.bf16 %v1790_v50, %v1898_v20 }
 0x163   : > { %v1366_v5 = vsel %vm475_vm7, %v1359_v21, %v1361_v58  ;;  %v1374_v7 = vsel %vm475_vm7, %v1361_v58, %v1359_v21 }
 0x164   : > { %2313 = vmatprep.subr.bf16.mxu1 %v2312_v0  ;;  %v1365_v54 = vpop.permute.xlu1 %1364  ;;  %v1388_v17 = vmul.f32 %v1381_v2, %v1366_v5  ;;  %v1389_v22 = vmul.f32 %v1385_v14, %v1374_v7 }
 0x165   : > { %2315 = vmatpush1.bf16.msra.mxu1 %v2314_v3  ;;  %v2176_v3 = vld [vmem:[%s3432_s3 + $0x10] sm:$0x3] }
 0x166   : > { %v1363_v51 = vpop.permute.xlu0 %1362  ;;  %v1472_v27 = vrot.slane %v1388_v17, 4  ;;  %v1473_v35 = vrot.slane %v1389_v22, 4  ;;  %v2191_v17 = vld [vmem:[%s3432_s3 + $0x10] sm:$0x3] }
 0x167   : > { %v1367_v55 = vsel %vm475_vm7, %v1363_v51, %v1365_v54  ;;  %v1375_v6 = vsel %vm475_vm7, %v1365_v54, %v1363_v51 }
 0x168   : > { %v1796_v52 = vpop.permute.xlu1 %1795  ;;  %v1390_v9 = vmul.f32 %v1381_v2, %v1367_v55  ;;  %v1391_v10 = vmul.f32 %v1385_v14, %v1375_v6  ;;  %v1419_v55 = vrot.slane %v2176_v3, %v2688_v29 }
 0x16a   : > { %v1794_v57 = vpop.permute.xlu0 %1793  ;;  %v1474_v28 = vrot.slane %v1390_v9, 4  ;;  %v1476_v16 = vrot.slane %v1391_v10, 4 }
 0x16b   : > { %v1801_v19 = vsel %vm475_vm7, %v1794_v57, %v1796_v52  ;;  %v1809_v56 = vsel %vm475_vm7, %v1796_v52, %v1794_v57 }
 0x16c   : > { %v1800_v15 = vpop.permute.xlu1 %1799  ;;  %v1823_v42 = vmul.f32 %v1816_v40, %v1801_v19  ;;  %v1824_v31 = vmul.f32 %v1820_v32, %v1809_v56  ;;  %v1475_v46 = vsel %vm247_vm0, %v1472_v27, %v1474_v28  ;;  %v1477_v41 = vsel %vm247_vm0, %v1473_v35, %v1476_v16 }
 0x16e   : > { %v1798_v39 = vpop.permute.xlu0 %1797  ;;  %v1907_v50 = vrot.slane %v1823_v42, 4 }
 0x16f   : > { %v1802_v60 = vsel %vm475_vm7, %v1798_v39, %v1800_v15  ;;  %v1810_v24 = vsel %vm475_vm7, %v1800_v15, %v1798_v39 }
 0x170   : > { %v1331_v25 = vpop.permute.xlu1 %1330  ;;  %v1825_v61 = vmul.f32 %v1816_v40, %v1802_v60  ;;  %v1826_v59 = vmul.f32 %v1820_v32, %v1810_v24  ;;  %v1850_v40 = vrot.slane %v2191_v17, %v2674_v23  ;;  %v1854_v32 = vrot.slane %v2191_v17, %v2688_v29 }
 0x172   : > { %v1329_v45 = vpop.permute.xlu0 %1328  ;;  %v1909_v53 = vrot.slane %v1825_v61, 4  ;;  %v1911_v62 = vrot.slane %v1826_v59, 4 }
 0x173   : > { %v1333_v36 = vsel %vm439_vm6, %v1329_v45, %v1331_v25  ;;  %v1341_v30 = vsel %vm439_vm6, %v1331_v25, %v1329_v45 }
 0x174   : > { %v1356_v34 = vmul.f32 %v3319_v33, %v1333_v36  ;;  %v1357_v1 = vmul.f32 %v3322_v26, %v1341_v30  ;;  %v1766_v11 = vpop.permute.xlu1 %1765  ;;  %v1908_v26 = vrot.slane %v1824_v31, 4  ;;  %v1910_v21 = vsel %vm247_vm0, %v1907_v50, %v1909_v53 }
 0x176   : > { %v1488_v63 = vsel %vm247_vm0, %v1356_v34, %v1472_v27  ;;  %v1764_v8 = vpop.permute.xlu0 %1763  ;;  %v1489_v13 = vsel %vm247_vm0, %v1357_v1, %v1473_v35  ;;  %v1912_v51 = vsel %vm247_vm0, %v1908_v26, %v1911_v62 }
 0x177   : > { %v1768_v43 = vsel %vm439_vm6, %v1764_v8, %v1766_v11  ;;  %v1776_v48 = vsel %vm439_vm6, %v1766_v11, %v1764_v8  ;;  %v2286_v49 = vpack.c.bf16 %v1477_v41, %v1489_v13  ;;  %v2288_v33 = vpack.c.bf16 %v1475_v46, %v1488_v63 }
 0x178   : > { %v1791_v58 = vmul.f32 %v3332_v44, %v1768_v43  ;;  %v1792_v12 = vmul.f32 %v3335_v37, %v1776_v48  ;;  %v1395_v20 = vpop.permute.xlu1 %1394  ;;  %v1415_v37 = vrot.slane %v2176_v3, %v2674_v23 }
 0x179   : > { %2287 = vmatprep.subr.bf16.mxu0 %v2286_v49 }
 0x17a   : > { %v1923_v0 = vsel %vm247_vm0, %v1791_v58, %v1907_v50  ;;  %2289 = vmatpush1.bf16.msra.mxu0 %v2288_v33  ;;  %v1393_v54 = vpop.permute.xlu0 %1392  ;;  %v1924_v47 = vsel %vm247_vm0, %v1792_v12, %v1908_v26 }
 0x17b   : > { %v2316_v52 = vpack.c.bf16 %v1912_v51, %v1924_v47  ;;  %v2318_v44 = vpack.c.bf16 %v1910_v21, %v1923_v0  ;;  %v1400_v57 = vsel %vm511_vm8, %v1393_v54, %v1395_v20  ;;  %v1408_v2 = vsel %vm511_vm8, %v1395_v20, %v1393_v54 }
 0x17c   : > { %v1399_v6 = vpop.permute.xlu1 %1398  ;;  %v1422_v15 = vmul.f32 %v1415_v37, %v1400_v57  ;;  %v1423_v9 = vmul.f32 %v1419_v55, %v1408_v2 }
 0x17d   : > { %2317 = vmatprep.subr.bf16.mxu1 %v2316_v52 }
 0x17e   : > { %2319 = vmatpush1.bf16.msra.mxu1 %v2318_v44  ;;  %v1397_v14 = vpop.permute.xlu0 %1396 }
 0x17f   : > { %v1401_v5 = vsel %vm511_vm8, %v1397_v14, %v1399_v6  ;;  %v1409_v7 = vsel %vm511_vm8, %v1399_v6, %v1397_v14 }
 0x180   : > { %v1424_v10 = vmul.f32 %v1415_v37, %v1401_v5  ;;  %v1425_v38 = vmul.f32 %v1419_v55, %v1409_v7  ;;  %v1830_v39 = vpop.permute.xlu1 %1829 }
 0x182   : > { %v2290_v22 = vpack.c.bf16 %v1425_v38, %v1423_v9  ;;  %v2293_v60 = vpack.c.bf16 %v1424_v10, %v1422_v15  ;;  %v1828_v24 = vpop.permute.xlu0 %1827 }
 0x183   : > { %v1835_v28 = vsel %vm511_vm8, %v1828_v24, %v1830_v39  ;;  %v1843_v16 = vsel %vm511_vm8, %v1830_v39, %v1828_v24 }
 0x184   : > { %2292 = vmatprep.subr.msk.bf16.mxu0 %vm3101_vm10, %v2290_v22  ;;  %v1834_v25 = vpop.permute.xlu1 %1833  ;;  %v1857_v61 = vmul.f32 %v1850_v40, %v1835_v28  ;;  %v1858_v29 = vmul.f32 %v1854_v32, %v1843_v16 }
 0x185   : > { %2295 = vmatpush1.bf16.msk.msra.mxu0 %vm3101_vm10, %v2293_v60 }
 0x186   : > { %v1832_v19 = vpop.permute.xlu0 %1831 }
 0x187   : > { %v1836_v56 = vsel %vm511_vm8, %v1832_v19, %v1834_v25  ;;  %v1844_v23 = vsel %vm511_vm8, %v1834_v25, %v1832_v19 }
 0x188   : > { %v1859_v59 = vmul.f32 %v1850_v40, %v1836_v56  ;;  %v1860_v45 = vmul.f32 %v1854_v32, %v1844_v23  ;;  %2179 = vmatmul.mubr.msk.f32.vlgmr.msra.gmra.mrb[2].mxu0 %vm608_vm11, %v3120_v18 }
 0x18a   : > { %v2320_v27 = vpack.c.bf16 %v1860_v45, %v1858_v29  ;;  %v2323_v35 = vpack.c.bf16 %v1859_v59, %v1857_v61 }
 0x18c   : > { %2322 = vmatprep.subr.msk.bf16.mxu1 %vm3101_vm10, %v2320_v27 }
 0x18d   : > { %2325 = vmatpush1.bf16.msk.msra.mxu1 %vm3101_vm10, %v2323_v35 }
 0x190   : > { %2194 = vmatmul.mubr.msk.f32.vlgmr.msra.gmra.mrb[2].mxu1 %vm608_vm11, %v3120_v18 }
 0x197   : > { %v606_v36 = vpop.permute.xlu0 %605 }
 0x1db   : > { %v684_v30 = vpop.f32.mrb[0].mxu0 }
 0x1dc   : > { %v686_v42 = vpop.f32.mrb[1].mxu0  ;;  %v685_v31 = vadd.f32 %v684_v30, %v606_v36 }
 0x1dd   : > { %v687_v34 = vadd.f32 %v686_v42, %v606_v36 }
 0x1de   : > { %689 = vst [vmem:[%s219_s5] sm:$0xff] %v685_v31 }
 0x1df   : > { %690 = vst [vmem:[%s219_s5 + $0x8] sm:$0xff] %v687_v34 }
 0x1e3   : > { %v1127_v4 = vpop.f32.mrb[0].mxu1 }
 0x1e4   : > { %v1129_v1 = vpop.f32.mrb[1].mxu1  ;;  %v1128_v18 = vadd.f32 %v1127_v4, %v606_v36 }
 0x1e5   : > { %v1130_v11 = vadd.f32 %v1129_v1, %v606_v36 }
 0x1e6   : > { %1132 = vst [vmem:[%s219_s5 + $0x10] sm:$0xff] %v1128_v18 }
 0x1e7   : > { %1133 = vst [vmem:[%s219_s5 + $0x18] sm:$0xff] %v1130_v11 }
 0x25b   : > { %v1562_v46 = vpop.f32.mrb[2].mxu0 }
 0x25c   : > { %v1563_v41 = vadd.f32 %v1562_v46, %v606_v36  ;;  %v1564_v53 = vpop.f32.mrb[3].mxu0 }
 0x25d   : > { %v1565_v62 = vadd.f32 %v1564_v53, %v606_v36 }
 0x25e   : > { %1567 = vst [vmem:[%s219_s5 + $0x20] sm:$0xff] %v1563_v41 }
 0x25f   : > { %1568 = vst [vmem:[%s219_s5 + $0x28] sm:$0xff] %v1565_v62 }
 0x263   : > { %v1997_v63 = vpop.f32.mrb[2].mxu1 }
 0x264   : > { %v1998_v8 = vadd.f32 %v1997_v63, %v606_v36  ;;  %v1999_v13 = vpop.f32.mrb[3].mxu1 }
 0x265   : > { %v2000_v43 = vadd.f32 %v1999_v13, %v606_v36 }
 0x266   : > { %2002 = vst [vmem:[%s219_s5 + $0x30] sm:$0xff] %v1998_v8 }
 0x267   : > { %2003 = vst [vmem:[%s219_s5 + $0x38] sm:$0xff] %v2000_v43 }
 0x268 PF: > { %s14_s19 = sadd.s32 1, %s2431_s19   ;;  %s3436_s15 = smov %s2423_s17 }
 0x269   : > { %p11_p7 = scmp.ge.s32.totalorder %s14_s19, 6   ;;  %s3437_s16 = smov %s2427_s18 }
 0x26a   : > { %s3438_s17 = smov %s3441_s20  ;;  %s3439_s18 = smov %s3445_s21 }
 0x26b   :  { %13 = sbr.rel (!%p11_p7) target bundleno = 3 (0x3), region = 81 }

</bundles_post_ra>
